<compile_context>
chip_gen: v7x
topology: tpu7x:2x2x1
jax: 0.10.0
libtpu: 0.0.40
codegen_flags: <defaults>
</compile_context>

<pallas_src>
import jax
import jax.numpy as jnp
from jax.experimental import pallas as pl
from jax.experimental.pallas import tpu as pltpu

LN_EPS = 1e-5  # torch nn.LayerNorm default eps


def _layernorm(v, g, b):
    mu = jnp.mean(v, axis=-1, keepdims=True)
    var = jnp.mean((v - mu) ** 2, axis=-1, keepdims=True)
    return (v - mu) * jax.lax.rsqrt(var + LN_EPS) * g + b


# ---------------------------------------------------------------------------
# Kernel: one grid step processes TB batch elements.
#   vecd  rows: 0=ln_g 1=ln_b 2=bp 3=br 4=bf2   (shape (8, D))
#   vec2d rows: 0=bf1  1=flg  2=flb             (shape (8, 2D))
# ---------------------------------------------------------------------------
def film_kernel(x_ref, z_ref, xm_ref, zm_ref, sf_ref, rf_ref,
                vecd_ref, vec2d_ref, wp_ref, wr_ref, wf1_ref, wf2_ref,
                out_ref):
    TB, Lx, D = x_ref.shape
    Lz = z_ref.shape[1]

    g = vecd_ref[0:1, :]
    bt = vecd_ref[1:2, :]

    # Flatten the super-block so LN + projection run as one big matmul.
    # (Lx, Lz multiples of 8 -> this reshape is a zero-cost relayout.)
    x = x_ref[...].reshape(TB * Lx, D)
    z = z_ref[...].reshape(TB * Lz, D)

    x_ln = _layernorm(x, g, bt)
    z_ln = _layernorm(z, g, bt)

    x_proj = (jnp.dot(x_ln, wp_ref[...], preferred_element_type=jnp.float32)
              + vecd_ref[2:3, :]).reshape(TB, Lx, D) + sf_ref[...]
    z_proj = (jnp.dot(z_ln, wr_ref[...], preferred_element_type=jnp.float32)
              + vecd_ref[3:4, :]).reshape(TB, Lz, D) + rf_ref[...]

    # masked pooling (torch semantics: max over mask-multiplied values)
    xm = xm_ref[...]                       # (TB, Lx, 1)
    zm = zm_ref[...]                       # (TB, Lz, 1)
    xw = x_proj * xm
    zw = z_proj * zm

    x_max = jnp.max(xw, axis=1)                                     # (TB, D)
    z_max = jnp.max(zw, axis=1)
    x_mean = jnp.sum(xw, axis=1) / (jnp.sum(xm, axis=1) + 1e-8)
    z_mean = jnp.sum(zw, axis=1) / (jnp.sum(zm, axis=1) + 1e-8)

    # fusion layer: single (TB, 4D) @ (4D, 2D) matmul on the lane-concat
    pooled = jnp.concatenate([x_max, x_mean, z_max, z_mean], axis=-1)

    h = (jnp.dot(pooled, wf1_ref[...], preferred_element_type=jnp.float32)
         + vec2d_ref[0:1, :])
    h = jnp.maximum(h, 0.0)
    h = _layernorm(h, vec2d_ref[1:2, :], vec2d_ref[2:3, :])         # (TB, 2D)
    out = (jnp.dot(h, wf2_ref[...], preferred_element_type=jnp.float32)
           + vecd_ref[4:5, :])                                      # (TB, D)

    # TODO(synk): dropout(0.1) is identity in eval mode; training-mode masking not implemented.
    out_ref[...] = out.reshape(TB, 1, D)


# ---------------------------------------------------------------------------
# Parameters
# ---------------------------------------------------------------------------
def init_params(key, D):
    ks = jax.random.split(key, 16)

    def lin_w(k, din, dout):
        return (jax.random.normal(k, (din, dout), jnp.float32)
                * (1.0 / jnp.sqrt(din)))

    def lin_b(k, dout):
        return jax.random.normal(k, (1, dout), jnp.float32) * 0.02

    params = {
        "ln_g": jnp.ones((1, D), jnp.float32) + 0.05 * jax.random.normal(ks[0], (1, D)),
        "ln_b": 0.05 * jax.random.normal(ks[1], (1, D)),
        "wp": lin_w(ks[2], D, D), "bp": lin_b(ks[3], D),
        "wr": lin_w(ks[4], D, D), "br": lin_b(ks[5], D),
        "sw1": lin_w(ks[6], 1, 64), "sb1": lin_b(ks[7], 64),
        "sw2": lin_w(ks[8], 64, D), "sb2": lin_b(ks[9], D),
        "slg": jnp.ones((1, D), jnp.float32), "slb": jnp.zeros((1, D), jnp.float32),
        "rw1": lin_w(ks[10], 1, 64), "rb1": lin_b(ks[11], 64),
        "rw2": lin_w(ks[12], 64, D), "rb2": lin_b(ks[13], D),
        "rlg": jnp.ones((1, D), jnp.float32), "rlb": jnp.zeros((1, D), jnp.float32),
        "wf1": lin_w(ks[14], 4 * D, 2 * D), "bf1": jnp.zeros((1, 2 * D), jnp.float32),
        "flg": jnp.ones((1, 2 * D), jnp.float32), "flb": jnp.zeros((1, 2 * D), jnp.float32),
        "wf2": lin_w(ks[15], 2 * D, D), "bf2": jnp.zeros((1, D), jnp.float32),
    }
    return params


def _cdiv(a, b):
    return -(-a // b)


def _pick_tb(B, Lx, Lz, D):
    """Batch elements per grid step."""
    L = max(1, min(Lx, Lz))
    # Target >=128 LHS rows per projection matmul (full MXU height on v5e).
    tb = max(1, min(B, _cdiv(128, L)))
    # VMEM guard: keep double-buffered x+z blocks under ~4 MiB (safe on v7x's
    # 64 MiB VMEM / 32 MiB scoped default, and far below v5e/v6e limits).
    per_b = (Lx + Lz) * D * 4 * 2
    tb = max(1, min(tb, (4 << 20) // max(per_b, 1)))
    # Prefer >=2 grid steps (dual-TC v7x) only if each step keeps >=128 rows.
    if _cdiv(B, tb) < 2 and B >= 2 and (B // 2) * L >= 128:
        tb = _cdiv(B, 2)
    return tb


# ---------------------------------------------------------------------------
# Wrapper
# ---------------------------------------------------------------------------
@jax.jit
def film_forward(params, x, z, x_mask, z_mask, seq_bulk, rec_bulk):
    p = params
    B, Lx, D = x.shape
    Lz = z.shape[1]

    TB = _pick_tb(B, Lx, Lz, D)
    steps = _cdiv(B, TB)
    B_pad = steps * TB

    # --- hoisted out of the kernel: 1-row seq/rec bulk MLPs (plain XLA) ---
    sb = seq_bulk.astype(jnp.float32).reshape(B, 1)
    rb = rec_bulk.astype(jnp.float32).reshape(B, 1)
    sf = _layernorm(jnp.maximum(sb @ p["sw1"] + p["sb1"], 0.0) @ p["sw2"] + p["sb2"],
                    p["slg"], p["slb"]).reshape(B, 1, D)
    rf = _layernorm(jnp.maximum(rb @ p["rw1"] + p["rb1"], 0.0) @ p["rw2"] + p["rb2"],
                    p["rlg"], p["rlb"]).reshape(B, 1, D)

    xm = x_mask.astype(jnp.float32).reshape(B, Lx, 1)
    zm = z_mask.astype(jnp.float32).reshape(B, Lz, 1)

    # --- pack the small parameter vectors into two stacked arrays ---
    vecd = jnp.concatenate(
        [p["ln_g"], p["ln_b"], p["bp"], p["br"], p["bf2"],
         jnp.zeros((3, D), jnp.float32)], axis=0)              # (8, D)
    vec2d = jnp.concatenate(
        [p["bf1"], p["flg"], p["flb"],
         jnp.zeros((5, 2 * D), jnp.float32)], axis=0)          # (8, 2D)

    # --- pad batch to a multiple of TB (padded rows have zero masks) ---
    xf = x.astype(jnp.float32)
    zf = z.astype(jnp.float32)
    pad = B_pad - B
    if pad:
        pad3 = ((0, pad), (0, 0), (0, 0))
        xf = jnp.pad(xf, pad3)
        zf = jnp.pad(zf, pad3)
        xm = jnp.pad(xm, pad3)
        zm = jnp.pad(zm, pad3)
        sf = jnp.pad(sf, pad3)
        rf = jnp.pad(rf, pad3)

    def batch3(L, C):
        return pl.BlockSpec((TB, L, C), lambda i: (i, 0, 0))

    def full2(a):
        return pl.BlockSpec(a.shape, lambda i: (0, 0))

    out = pl.pallas_call(
        film_kernel,
        out_shape=jax.ShapeDtypeStruct((B_pad, 1, D), jnp.float32),
        grid_spec=pltpu.PrefetchScalarGridSpec(
            num_scalar_prefetch=0,
            grid=(steps,),
            in_specs=[
                batch3(Lx, D), batch3(Lz, D),      # x, z
                batch3(Lx, 1), batch3(Lz, 1),      # masks
                batch3(1, D), batch3(1, D),        # sf, rf (hoisted bulk MLPs)
                full2(vecd), full2(vec2d),         # packed small vectors
                full2(p["wp"]), full2(p["wr"]),
                full2(p["wf1"]), full2(p["wf2"]),
            ],
            out_specs=pl.BlockSpec((TB, 1, D), lambda i: (i, 0, 0)),
        ),
        compiler_params=pltpu.CompilerParams(
            dimension_semantics=("parallel",)),
    )(xf, zf, xm, zm, sf, rf, vecd, vec2d,
      p["wp"], p["wr"], p["wf1"], p["wf2"])

    return out[:B].reshape(B, D)


# ---------------------------------------------------------------------------
# Pure-JAX reference replicating the PyTorch forward (eval mode)
# ---------------------------------------------------------------------------
def film_reference(params, x, z, x_mask, z_mask, seq_bulk, rec_bulk):
    p = params
    ln = _layernorm
    x = ln(x, p["ln_g"], p["ln_b"])
    z = ln(z, p["ln_g"], p["ln_b"])
    x_proj = x @ p["wp"] + p["bp"]
    z_proj = z @ p["wr"] + p["br"]

    sb = seq_bulk.astype(jnp.float32)[:, None]
    rb = rec_bulk.astype(jnp.float32)[:, None]
    sf = ln(jnp.maximum(sb @ p["sw1"] + p["sb1"], 0.0) @ p["sw2"] + p["sb2"],
            p["slg"], p["slb"])
    rf = ln(jnp.maximum(rb @ p["rw1"] + p["rb1"], 0.0) @ p["rw2"] + p["rb2"],
            p["rlg"], p["rlb"])
    x_proj = x_proj + sf[:, None, :]
    z_proj = z_proj + rf[:, None, :]

    xm = x_mask.astype(jnp.float32)[..., None]
    zm = z_mask.astype(jnp.float32)[..., None]
    x_max = jnp.max(x_proj * xm, axis=1)
    x_mean = jnp.sum(x_proj * xm, axis=1) / (jnp.sum(xm, axis=1) + 1e-8)
    z_max = jnp.max(z_proj * zm, axis=1)
    z_mean = jnp.sum(z_proj * zm, axis=1) / (jnp.sum(zm, axis=1) + 1e-8)
    pooled = jnp.concatenate([x_max, x_mean, z_max, z_mean], axis=-1)
    h = jnp.maximum(pooled @ p["wf1"] + p["bf1"], 0.0)
    h = ln(h, p["flg"], p["flb"])
    return h @ p["wf2"] + p["bf2"]


if __name__ == "__main__":
    # Note: Lx, Lz chosen as multiples of 8 so in-kernel (TB,L,D)->(TB*L,D)
    # reshapes are zero-cost relayouts.
    B, Lx, Lz, D = 2, 16, 24, 128

    key = jax.random.PRNGKey(0)
    k_par, kx, kz, kmx, kmz, ksb, krb = jax.random.split(key, 7)

    params = init_params(k_par, D)

    x = jax.random.normal(kx, (B, Lx, D), jnp.float32)
    z = jax.random.normal(kz, (B, Lz, D), jnp.float32)
    x_mask = (jax.random.uniform(kmx, (B, Lx)) > 0.25).astype(jnp.float32)
    z_mask = (jax.random.uniform(kmz, (B, Lz)) > 0.25).astype(jnp.float32)
    seq_bulk = jax.random.uniform(ksb, (B,), jnp.float32) * 5.0
    rec_bulk = jax.random.uniform(krb, (B,), jnp.float32) * 5.0

    out = film_forward(params, x, z, x_mask, z_mask, seq_bulk, rec_bulk)
    out = jax.block_until_ready(out)

    ref = film_reference(params, x, z, x_mask, z_mask, seq_bulk, rec_bulk)
    if not jnp.allclose(out, ref, rtol=1e-4, atol=1e-4):
        raise AssertionError("Pallas kernel output does not match JAX reference")

    print("KERNEL_OK")
</pallas_src>

<mosaic_0001>
module attributes {stable_mosaic.version = 11 : i64} {
  func.func @film_kernel(%arg0: i32, %arg1: memref<2x16x128xf32, #tpu.memory_space<vmem>>, %arg2: memref<2x24x128xf32, #tpu.memory_space<vmem>>, %arg3: memref<2x16x1xf32, #tpu.memory_space<vmem>>, %arg4: memref<2x24x1xf32, #tpu.memory_space<vmem>>, %arg5: memref<2x1x128xf32, #tpu.memory_space<vmem>>, %arg6: memref<2x1x128xf32, #tpu.memory_space<vmem>>, %arg7: memref<8x128xf32, #tpu.memory_space<vmem>>, %arg8: memref<8x256xf32, #tpu.memory_space<vmem>>, %arg9: memref<128x128xf32, #tpu.memory_space<vmem>>, %arg10: memref<128x128xf32, #tpu.memory_space<vmem>>, %arg11: memref<512x256xf32, #tpu.memory_space<vmem>>, %arg12: memref<256x128xf32, #tpu.memory_space<vmem>>, %arg13: memref<2x1x128xf32, #tpu.memory_space<vmem>>) attributes {dimension_semantics = [#tpu.dimension_semantics<parallel>], iteration_bounds = array<i64: 1>, scalar_prefetch = 0 : i64, scratch_operands = 0 : i64, tpu.core_type = #tpu.core_type<tc>, window_params = [{transform_indices = @transform_0, window_bounds = array<i64: 2, 16, 128>}, {transform_indices = @transform_1, window_bounds = array<i64: 2, 24, 128>}, {transform_indices = @transform_2, window_bounds = array<i64: 2, 16, 1>}, {transform_indices = @transform_3, window_bounds = array<i64: 2, 24, 1>}, {transform_indices = @transform_4, window_bounds = array<i64: 2, 1, 128>}, {transform_indices = @transform_5, window_bounds = array<i64: 2, 1, 128>}, {pipeline_mode = #tpu.pipeline_mode<synchronous>, transform_indices = @transform_6, window_bounds = array<i64: 8, 128>}, {pipeline_mode = #tpu.pipeline_mode<synchronous>, transform_indices = @transform_7, window_bounds = array<i64: 8, 256>}, {pipeline_mode = #tpu.pipeline_mode<synchronous>, transform_indices = @transform_8, window_bounds = array<i64: 128, 128>}, {pipeline_mode = #tpu.pipeline_mode<synchronous>, transform_indices = @transform_9, window_bounds = array<i64: 128, 128>}, {pipeline_mode = #tpu.pipeline_mode<synchronous>, transform_indices = @transform_10, window_bounds = array<i64: 512, 256>}, {pipeline_mode = #tpu.pipeline_mode<synchronous>, transform_indices = @transform_11, window_bounds = array<i64: 256, 128>}, {transform_indices = @transform_12, window_bounds = array<i64: 2, 1, 128>}]} {
    %c0 = arith.constant 0 : index
    %c0_0 = arith.constant 0 : index
    %0 = vector.load %arg7[%c0, %c0_0] : memref<8x128xf32, #tpu.memory_space<vmem>>, vector<1x128xf32>
    %c1 = arith.constant 1 : index
    %c0_1 = arith.constant 0 : index
    %1 = vector.load %arg7[%c1, %c0_1] : memref<8x128xf32, #tpu.memory_space<vmem>>, vector<1x128xf32>
    %c0_2 = arith.constant 0 : index
    %c0_3 = arith.constant 0 : index
    %c0_4 = arith.constant 0 : index
    %2 = vector.load %arg1[%c0_2, %c0_3, %c0_4] : memref<2x16x128xf32, #tpu.memory_space<vmem>>, vector<2x16x128xf32>
    %3 = vector.shape_cast %2 : vector<2x16x128xf32> to vector<32x128xf32>
    %c0_5 = arith.constant 0 : index
    %c0_6 = arith.constant 0 : index
    %c0_7 = arith.constant 0 : index
    %4 = vector.load %arg2[%c0_5, %c0_6, %c0_7] : memref<2x24x128xf32, #tpu.memory_space<vmem>>, vector<2x24x128xf32>
    %5 = vector.shape_cast %4 : vector<2x24x128xf32> to vector<48x128xf32>
    %cst = arith.constant dense<0.000000e+00> : vector<32xf32>
    %6 = vector.multi_reduction <add>, %3, %cst [1] : vector<32x128xf32> to vector<32xf32>
    %7 = vector.shape_cast %6 : vector<32xf32> to vector<32x1xf32>
    %cst_8 = arith.constant 1.280000e+02 : f32
    %8 = vector.broadcast %cst_8 : f32 to vector<32x1xf32>
    %9 = arith.divf %7, %8 : vector<32x1xf32>
    %10 = vector.broadcast %9 : vector<32x1xf32> to vector<32x128xf32>
    %11 = arith.subf %3, %10 : vector<32x128xf32>
    %12 = arith.mulf %11, %11 : vector<32x128xf32>
    %cst_9 = arith.constant dense<0.000000e+00> : vector<32xf32>
    %13 = vector.multi_reduction <add>, %12, %cst_9 [1] : vector<32x128xf32> to vector<32xf32>
    %14 = vector.shape_cast %13 : vector<32xf32> to vector<32x1xf32>
    %cst_10 = arith.constant 1.280000e+02 : f32
    %15 = vector.broadcast %cst_10 : f32 to vector<32x1xf32>
    %16 = arith.divf %14, %15 : vector<32x1xf32>
    %17 = vector.broadcast %9 : vector<32x1xf32> to vector<32x128xf32>
    %18 = arith.subf %3, %17 : vector<32x128xf32>
    %cst_11 = arith.constant 9.99999974E-6 : f32
    %19 = vector.broadcast %cst_11 : f32 to vector<32x1xf32>
    %20 = arith.addf %16, %19 : vector<32x1xf32>
    %21 = math.rsqrt %20 : vector<32x1xf32>
    %22 = vector.broadcast %21 : vector<32x1xf32> to vector<32x128xf32>
    %23 = arith.mulf %18, %22 : vector<32x128xf32>
    %24 = vector.broadcast %0 : vector<1x128xf32> to vector<32x128xf32>
    %25 = arith.mulf %23, %24 : vector<32x128xf32>
    %26 = vector.broadcast %1 : vector<1x128xf32> to vector<32x128xf32>
    %27 = arith.addf %25, %26 : vector<32x128xf32>
    %cst_12 = arith.constant dense<0.000000e+00> : vector<48xf32>
    %28 = vector.multi_reduction <add>, %5, %cst_12 [1] : vector<48x128xf32> to vector<48xf32>
    %29 = vector.shape_cast %28 : vector<48xf32> to vector<48x1xf32>
    %cst_13 = arith.constant 1.280000e+02 : f32
    %30 = vector.broadcast %cst_13 : f32 to vector<48x1xf32>
    %31 = arith.divf %29, %30 : vector<48x1xf32>
    %32 = vector.broadcast %31 : vector<48x1xf32> to vector<48x128xf32>
    %33 = arith.subf %5, %32 : vector<48x128xf32>
    %34 = arith.mulf %33, %33 : vector<48x128xf32>
    %cst_14 = arith.constant dense<0.000000e+00> : vector<48xf32>
    %35 = vector.multi_reduction <add>, %34, %cst_14 [1] : vector<48x128xf32> to vector<48xf32>
    %36 = vector.shape_cast %35 : vector<48xf32> to vector<48x1xf32>
    %cst_15 = arith.constant 1.280000e+02 : f32
    %37 = vector.broadcast %cst_15 : f32 to vector<48x1xf32>
    %38 = arith.divf %36, %37 : vector<48x1xf32>
    %39 = vector.broadcast %31 : vector<48x1xf32> to vector<48x128xf32>
    %40 = arith.subf %5, %39 : vector<48x128xf32>
    %cst_16 = arith.constant 9.99999974E-6 : f32
    %41 = vector.broadcast %cst_16 : f32 to vector<48x1xf32>
    %42 = arith.addf %38, %41 : vector<48x1xf32>
    %43 = math.rsqrt %42 : vector<48x1xf32>
    %44 = vector.broadcast %43 : vector<48x1xf32> to vector<48x128xf32>
    %45 = arith.mulf %40, %44 : vector<48x128xf32>
    %46 = vector.broadcast %0 : vector<1x128xf32> to vector<48x128xf32>
    %47 = arith.mulf %45, %46 : vector<48x128xf32>
    %48 = vector.broadcast %1 : vector<1x128xf32> to vector<48x128xf32>
    %49 = arith.addf %47, %48 : vector<48x128xf32>
    %c0_17 = arith.constant 0 : index
    %c0_18 = arith.constant 0 : index
    %50 = vector.load %arg9[%c0_17, %c0_18] : memref<128x128xf32, #tpu.memory_space<vmem>>, vector<128x128xf32>
    %cst_19 = arith.constant dense<0.000000e+00> : vector<32x128xf32>
    %51 = tpu.matmul %27, %50, %cst_19 {dimension_numbers = #tpu.dot_dimension_numbers<[1], [0], [0], [1], [0, 0, 1, 1], [], []>} : vector<32x128xf32>, vector<128x128xf32>, vector<32x128xf32> -> vector<32x128xf32>
    %c2 = arith.constant 2 : index
    %c0_20 = arith.constant 0 : index
    %52 = vector.load %arg7[%c2, %c0_20] : memref<8x128xf32, #tpu.memory_space<vmem>>, vector<1x128xf32>
    %53 = vector.broadcast %52 : vector<1x128xf32> to vector<32x128xf32>
    %54 = arith.addf %51, %53 : vector<32x128xf32>
    %55 = vector.shape_cast %54 : vector<32x128xf32> to vector<2x16x128xf32>
    %c0_21 = arith.constant 0 : index
    %c0_22 = arith.constant 0 : index
    %c0_23 = arith.constant 0 : index
    %56 = vector.load %arg5[%c0_21, %c0_22, %c0_23] : memref<2x1x128xf32, #tpu.memory_space<vmem>>, vector<2x1x128xf32>
    %57 = vector.broadcast %56 : vector<2x1x128xf32> to vector<2x16x128xf32>
    %58 = arith.addf %55, %57 : vector<2x16x128xf32>
    %c0_24 = arith.constant 0 : index
    %c0_25 = arith.constant 0 : index
    %59 = vector.load %arg10[%c0_24, %c0_25] : memref<128x128xf32, #tpu.memory_space<vmem>>, vector<128x128xf32>
    %cst_26 = arith.constant dense<0.000000e+00> : vector<48x128xf32>
    %60 = tpu.matmul %49, %59, %cst_26 {dimension_numbers = #tpu.dot_dimension_numbers<[1], [0], [0], [1], [0, 0, 1, 1], [], []>} : vector<48x128xf32>, vector<128x128xf32>, vector<48x128xf32> -> vector<48x128xf32>
    %c3 = arith.constant 3 : index
    %c0_27 = arith.constant 0 : index
    %61 = vector.load %arg7[%c3, %c0_27] : memref<8x128xf32, #tpu.memory_space<vmem>>, vector<1x128xf32>
    %62 = vector.broadcast %61 : vector<1x128xf32> to vector<48x128xf32>
    %63 = arith.addf %60, %62 : vector<48x128xf32>
    %64 = vector.shape_cast %63 : vector<48x128xf32> to vector<2x24x128xf32>
    %c0_28 = arith.constant 0 : index
    %c0_29 = arith.constant 0 : index
    %c0_30 = arith.constant 0 : index
    %65 = vector.load %arg6[%c0_28, %c0_29, %c0_30] : memref<2x1x128xf32, #tpu.memory_space<vmem>>, vector<2x1x128xf32>
    %66 = vector.broadcast %65 : vector<2x1x128xf32> to vector<2x24x128xf32>
    %67 = arith.addf %64, %66 : vector<2x24x128xf32>
    %c0_31 = arith.constant 0 : index
    %c0_32 = arith.constant 0 : index
    %c0_33 = arith.constant 0 : index
    %68 = vector.load %arg3[%c0_31, %c0_32, %c0_33] : memref<2x16x1xf32, #tpu.memory_space<vmem>>, vector<2x16x1xf32>
    %c0_34 = arith.constant 0 : index
    %c0_35 = arith.constant 0 : index
    %c0_36 = arith.constant 0 : index
    %69 = vector.load %arg4[%c0_34, %c0_35, %c0_36] : memref<2x24x1xf32, #tpu.memory_space<vmem>>, vector<2x24x1xf32>
    %70 = vector.broadcast %68 : vector<2x16x1xf32> to vector<2x16x128xf32>
    %71 = arith.mulf %58, %70 : vector<2x16x128xf32>
    %72 = vector.broadcast %69 : vector<2x24x1xf32> to vector<2x24x128xf32>
    %73 = arith.mulf %67, %72 : vector<2x24x128xf32>
    %cst_37 = arith.constant dense<0xFF800000> : vector<2x128xf32>
    %74 = vector.multi_reduction <maximumf>, %71, %cst_37 [1] : vector<2x16x128xf32> to vector<2x128xf32>
    %cst_38 = arith.constant dense<0xFF800000> : vector<2x128xf32>
    %75 = vector.multi_reduction <maximumf>, %73, %cst_38 [1] : vector<2x24x128xf32> to vector<2x128xf32>
    %cst_39 = arith.constant dense<0.000000e+00> : vector<2x128xf32>
    %76 = vector.multi_reduction <add>, %71, %cst_39 [1] : vector<2x16x128xf32> to vector<2x128xf32>
    %cst_40 = arith.constant dense<0.000000e+00> : vector<2x1xf32>
    %77 = vector.multi_reduction <add>, %68, %cst_40 [1] : vector<2x16x1xf32> to vector<2x1xf32>
    %cst_41 = arith.constant 9.99999993E-9 : f32
    %78 = vector.broadcast %cst_41 : f32 to vector<2x1xf32>
    %79 = arith.addf %77, %78 : vector<2x1xf32>
    %80 = vector.broadcast %79 : vector<2x1xf32> to vector<2x128xf32>
    %81 = arith.divf %76, %80 : vector<2x128xf32>
    %cst_42 = arith.constant dense<0.000000e+00> : vector<2x128xf32>
    %82 = vector.multi_reduction <add>, %73, %cst_42 [1] : vector<2x24x128xf32> to vector<2x128xf32>
    %cst_43 = arith.constant dense<0.000000e+00> : vector<2x1xf32>
    %83 = vector.multi_reduction <add>, %69, %cst_43 [1] : vector<2x24x1xf32> to vector<2x1xf32>
    %cst_44 = arith.constant 9.99999993E-9 : f32
    %84 = vector.broadcast %cst_44 : f32 to vector<2x1xf32>
    %85 = arith.addf %83, %84 : vector<2x1xf32>
    %86 = vector.broadcast %85 : vector<2x1xf32> to vector<2x128xf32>
    %87 = arith.divf %82, %86 : vector<2x128xf32>
    %88 = tpu.concatenate %74, %81, %75, %87 in 1 : vector<2x128xf32>, vector<2x128xf32>, vector<2x128xf32>, vector<2x128xf32> -> vector<2x512xf32>
    %c0_45 = arith.constant 0 : index
    %c0_46 = arith.constant 0 : index
    %89 = vector.load %arg11[%c0_45, %c0_46] : memref<512x256xf32, #tpu.memory_space<vmem>>, vector<512x256xf32>
    %cst_47 = arith.constant dense<0.000000e+00> : vector<2x256xf32>
    %90 = tpu.matmul %88, %89, %cst_47 {dimension_numbers = #tpu.dot_dimension_numbers<[1], [0], [0], [1], [0, 0, 1, 1], [], []>} : vector<2x512xf32>, vector<512x256xf32>, vector<2x256xf32> -> vector<2x256xf32>
    %c0_48 = arith.constant 0 : index
    %c0_49 = arith.constant 0 : index
    %91 = vector.load %arg8[%c0_48, %c0_49] : memref<8x256xf32, #tpu.memory_space<vmem>>, vector<1x256xf32>
    %92 = vector.broadcast %91 : vector<1x256xf32> to vector<2x256xf32>
    %93 = arith.addf %90, %92 : vector<2x256xf32>
    %cst_50 = arith.constant 0.000000e+00 : f32
    %94 = vector.broadcast %cst_50 : f32 to vector<2x256xf32>
    %95 = arith.maximumf %93, %94 : vector<2x256xf32>
    %c1_51 = arith.constant 1 : index
    %c0_52 = arith.constant 0 : index
    %96 = vector.load %arg8[%c1_51, %c0_52] : memref<8x256xf32, #tpu.memory_space<vmem>>, vector<1x256xf32>
    %c2_53 = arith.constant 2 : index
    %c0_54 = arith.constant 0 : index
    %97 = vector.load %arg8[%c2_53, %c0_54] : memref<8x256xf32, #tpu.memory_space<vmem>>, vector<1x256xf32>
    %cst_55 = arith.constant dense<0.000000e+00> : vector<2xf32>
    %98 = vector.multi_reduction <add>, %95, %cst_55 [1] : vector<2x256xf32> to vector<2xf32>
    %99 = vector.shape_cast %98 : vector<2xf32> to vector<2x1xf32>
    %cst_56 = arith.constant 2.560000e+02 : f32
    %100 = vector.broadcast %cst_56 : f32 to vector<2x1xf32>
    %101 = arith.divf %99, %100 : vector<2x1xf32>
    %102 = vector.broadcast %101 : vector<2x1xf32> to vector<2x256xf32>
    %103 = arith.subf %95, %102 : vector<2x256xf32>
    %104 = arith.mulf %103, %103 : vector<2x256xf32>
    %cst_57 = arith.constant dense<0.000000e+00> : vector<2xf32>
    %105 = vector.multi_reduction <add>, %104, %cst_57 [1] : vector<2x256xf32> to vector<2xf32>
    %106 = vector.shape_cast %105 : vector<2xf32> to vector<2x1xf32>
    %cst_58 = arith.constant 2.560000e+02 : f32
    %107 = vector.broadcast %cst_58 : f32 to vector<2x1xf32>
    %108 = arith.divf %106, %107 : vector<2x1xf32>
    %109 = vector.broadcast %101 : vector<2x1xf32> to vector<2x256xf32>
    %110 = arith.subf %95, %109 : vector<2x256xf32>
    %cst_59 = arith.constant 9.99999974E-6 : f32
    %111 = vector.broadcast %cst_59 : f32 to vector<2x1xf32>
    %112 = arith.addf %108, %111 : vector<2x1xf32>
    %113 = math.rsqrt %112 : vector<2x1xf32>
    %114 = vector.broadcast %113 : vector<2x1xf32> to vector<2x256xf32>
    %115 = arith.mulf %110, %114 : vector<2x256xf32>
    %116 = vector.broadcast %96 : vector<1x256xf32> to vector<2x256xf32>
    %117 = arith.mulf %115, %116 : vector<2x256xf32>
    %118 = vector.broadcast %97 : vector<1x256xf32> to vector<2x256xf32>
    %119 = arith.addf %117, %118 : vector<2x256xf32>
    %c0_60 = arith.constant 0 : index
    %c0_61 = arith.constant 0 : index
    %120 = vector.load %arg12[%c0_60, %c0_61] : memref<256x128xf32, #tpu.memory_space<vmem>>, vector<256x128xf32>
    %cst_62 = arith.constant dense<0.000000e+00> : vector<2x128xf32>
    %121 = tpu.matmul %119, %120, %cst_62 {dimension_numbers = #tpu.dot_dimension_numbers<[1], [0], [0], [1], [0, 0, 1, 1], [], []>} : vector<2x256xf32>, vector<256x128xf32>, vector<2x128xf32> -> vector<2x128xf32>
    %c4 = arith.constant 4 : index
    %c0_63 = arith.constant 0 : index
    %122 = vector.load %arg7[%c4, %c0_63] : memref<8x128xf32, #tpu.memory_space<vmem>>, vector<1x128xf32>
    %123 = vector.broadcast %122 : vector<1x128xf32> to vector<2x128xf32>
    %124 = arith.addf %121, %123 : vector<2x128xf32>
    %125 = vector.shape_cast %124 : vector<2x128xf32> to vector<2x1x128xf32>
    %c0_64 = arith.constant 0 : index
    %c0_65 = arith.constant 0 : index
    %c0_66 = arith.constant 0 : index
    %126 = vector.load %arg13[%c0_64, %c0_65, %c0_66] : memref<2x1x128xf32, #tpu.memory_space<vmem>>, vector<2x1x128xf32>
    tpu.vector_store %arg13[%c0_64, %c0_65, %c0_66], %125 {strides = array<i32>} : memref<2x1x128xf32, #tpu.memory_space<vmem>>, vector<2x1x128xf32>,
    return
  }
  func.func @transform_0(%arg0: i32) -> (i32, i32, i32) {
    %c0_i32 = arith.constant 0 : i32
    %c0_i32_0 = arith.constant 0 : i32
    %c0_i32_1 = arith.constant 0 : i32
    return %arg0, %c0_i32, %c0_i32_0 : i32, i32, i32
  }
  func.func @transform_1(%arg0: i32) -> (i32, i32, i32) {
    %c0_i32 = arith.constant 0 : i32
    %c0_i32_0 = arith.constant 0 : i32
    %c0_i32_1 = arith.constant 0 : i32
    return %arg0, %c0_i32, %c0_i32_0 : i32, i32, i32
  }
  func.func @transform_2(%arg0: i32) -> (i32, i32, i32) {
    %c0_i32 = arith.constant 0 : i32
    %c0_i32_0 = arith.constant 0 : i32
    %c0_i32_1 = arith.constant 0 : i32
    return %arg0, %c0_i32, %c0_i32_0 : i32, i32, i32
  }
  func.func @transform_3(%arg0: i32) -> (i32, i32, i32) {
    %c0_i32 = arith.constant 0 : i32
    %c0_i32_0 = arith.constant 0 : i32
    %c0_i32_1 = arith.constant 0 : i32
    return %arg0, %c0_i32, %c0_i32_0 : i32, i32, i32
  }
  func.func @transform_4(%arg0: i32) -> (i32, i32, i32) {
    %c0_i32 = arith.constant 0 : i32
    %c0_i32_0 = arith.constant 0 : i32
    %c0_i32_1 = arith.constant 0 : i32
    return %arg0, %c0_i32, %c0_i32_0 : i32, i32, i32
  }
  func.func @transform_5(%arg0: i32) -> (i32, i32, i32) {
    %c0_i32 = arith.constant 0 : i32
    %c0_i32_0 = arith.constant 0 : i32
    %c0_i32_1 = arith.constant 0 : i32
    return %arg0, %c0_i32, %c0_i32_0 : i32, i32, i32
  }
  func.func @transform_6(%arg0: i32) -> (i32, i32) {
    %c0_i32 = arith.constant 0 : i32
    %c0_i32_0 = arith.constant 0 : i32
    %c0_i32_1 = arith.constant 0 : i32
    return %c0_i32, %c0_i32_0 : i32, i32
  }
  func.func @transform_7(%arg0: i32) -> (i32, i32) {
    %c0_i32 = arith.constant 0 : i32
    %c0_i32_0 = arith.constant 0 : i32
    %c0_i32_1 = arith.constant 0 : i32
    return %c0_i32, %c0_i32_0 : i32, i32
  }
  func.func @transform_8(%arg0: i32) -> (i32, i32) {
    %c0_i32 = arith.constant 0 : i32
    %c0_i32_0 = arith.constant 0 : i32
    %c0_i32_1 = arith.constant 0 : i32
    return %c0_i32, %c0_i32_0 : i32, i32
  }
  func.func @transform_9(%arg0: i32) -> (i32, i32) {
    %c0_i32 = arith.constant 0 : i32
    %c0_i32_0 = arith.constant 0 : i32
    %c0_i32_1 = arith.constant 0 : i32
    return %c0_i32, %c0_i32_0 : i32, i32
  }
  func.func @transform_10(%arg0: i32) -> (i32, i32) {
    %c0_i32 = arith.constant 0 : i32
    %c0_i32_0 = arith.constant 0 : i32
    %c0_i32_1 = arith.constant 0 : i32
    return %c0_i32, %c0_i32_0 : i32, i32
  }
  func.func @transform_11(%arg0: i32) -> (i32, i32) {
    %c0_i32 = arith.constant 0 : i32
    %c0_i32_0 = arith.constant 0 : i32
    %c0_i32_1 = arith.constant 0 : i32
    return %c0_i32, %c0_i32_0 : i32, i32
  }
  func.func @transform_12(%arg0: i32) -> (i32, i32, i32) {
    %c0_i32 = arith.constant 0 : i32
    %c0_i32_0 = arith.constant 0 : i32
    %c0_i32_1 = arith.constant 0 : i32
    return %arg0, %c0_i32, %c0_i32_0 : i32, i32, i32
  }
}

</mosaic_0001>

<bundles_post_ra>
// kernel: film_forward.1
= control target key start
LH: loop header
LB: loop body
LE: loop exit
PB: predicated region body
PF: predicated region fallthrough
CT: control target
= control target key end

     0   :  { %17 = vsyncpa [#allocation3], 0  ;;  %s2217_s0 = inlined_call_operand.hbm [shape: f32[2,16,128], index: 0, kind: input, shape index: {}]   ;;  %s2218_s1 = inlined_call_operand.vmem [shape: f32[2,24,128], index: 1, kind: input, shape index: {}]   ;;  %s2219_s2 = inlined_call_operand.vmem [shape: f32[2,16,1], index: 2, kind: input, shape index: {}]   ;;  %s2220_s3 = inlined_call_operand.vmem [shape: f32[2,24,1], index: 3, kind: input, shape index: {}]   ;;  %s2221_s4 = inlined_call_operand.vmem [shape: f32[2,1,128], index: 4, kind: input, shape index: {}]   ;;  %s2222_s5 = inlined_call_operand.vmem [shape: f32[2,1,128], index: 5, kind: input, shape index: {}]   ;;  %s2223_s6 = inlined_call_operand.vmem [shape: f32[8,128], index: 6, kind: input, shape index: {}]   ;;  %s2224_s7 = inlined_call_operand.vmem [shape: f32[8,256], index: 7, kind: input, shape index: {}]   ;;  %s2225_s8 = inlined_call_operand.vmem [shape: f32[128,128], index: 8, kind: input, shape index: {}]   ;;  %s2226_s9 = inlined_call_operand.vmem [shape: f32[128,128], index: 9, kind: input, shape index: {}]   ;;  %s2227_s10 = inlined_call_operand.hbm [shape: f32[512,256], index: 10, kind: input, shape index: {}]   ;;  %s2228_s11 = inlined_call_operand.vmem [shape: f32[256,128], index: 11, kind: input, shape index: {}]   ;;  %s2229_s12 = inlined_call_operand.hbm [shape: f32[2,1,128], index: 12, kind: output, shape index: {}]  }
   0x1   :  { %18 = vsyncpa [#allocation6], 0 }
   0x2   :  { %19 = vsyncpa [#allocation4], 0  ;;  %s1700_s21 = smov [#allocation2]   ;;  %s1628_s25 = scalar_lea.hbm %s2217_s0, 512 }
   0x3   :  { %s25_s22 = sshll.u32 %s1700_s21, 4  ;;  %p1629_p0 = scmp.ne.s32.totalorder %s2217_s0, %s1628_s25  ;;  %s26_s22 = int_to_ptr.vmem [resolvable:$true] %s25_s22 }
   0x4   :  { %p1632_p1 = scmp.lt.u32.totalorder %s1628_s25, %s2217_s0 }
   0x6   :  { %p1634_p2 = pnand %p1632_p1, %p1629_p0 }
   0x8   :  { %1637 = shalt.err (!%p1634_p2)
}
   0x9   :  { %s1638_s30 = scalar_lea.vmem %s26_s22, 512  ;;  %p1643_p4 = scmp.lt.s32.totalorder %s26_s22, %s26_s22 }
   0xa   :  { %p1639_p3 = scmp.ne.s32.totalorder %s26_s22, %s1638_s30  ;;  %p1644_p5 = scmp.lt.s32.totalorder %s1638_s30, %s1638_s30 }
   0xc   :  { %p1645_p6 = por %p1644_p5, %p1643_p4 }
   0xe   :  { %p1646_p7 = pnand %p1645_p6, %p1639_p3 }
  0x10   :  { %1649 = shalt.err (!%p1646_p7)
}
  0x11   :  { %s1701_s13 = smov 128   ;;  %s1702_s14 = smov 8  }
  0x12   :  { %31 = dma.hbm_to_vmem [thread:$0]  %s2217_s0, 512, %s26_s22, [#allocation3], %s1701_s13, %s1701_s13, %s1702_s14  }
  0x13   :  { %s1703_s17 = smov [#allocation5]   ;;  %s1650_s21 = scalar_lea.hbm %s2227_s10, 16384 }
  0x14   :  { %s55_s18 = sshll.u32 %s1703_s17, 4  ;;  %p1651_p8 = scmp.ne.s32.totalorder %s2227_s10, %s1650_s21  ;;  %s56_s18 = int_to_ptr.vmem [resolvable:$true] %s55_s18 }
  0x15   :  { %p1654_p9 = scmp.lt.u32.totalorder %s1650_s21, %s2227_s10 }
  0x17   :  { %p1656_p10 = pnand %p1654_p9, %p1651_p8 }
  0x19   :  { %1659 = shalt.err (!%p1656_p10)
}
  0x1a   :  { %s1660_s27 = scalar_lea.vmem %s56_s18, 16384  ;;  %p1665_p12 = scmp.lt.s32.totalorder %s56_s18, %s56_s18 }
  0x1b   :  { %p1661_p11 = scmp.ne.s32.totalorder %s56_s18, %s1660_s27  ;;  %p1666_p13 = scmp.lt.s32.totalorder %s1660_s27, %s1660_s27 }
  0x1d   :  { %p1667_p0 = por %p1666_p13, %p1665_p12 }
  0x1f   :  { %p1668_p1 = pnand %p1667_p0, %p1661_p11 }
  0x21   :  { %1671 = shalt.err (!%p1668_p1)
}
  0x22   :  { %s1704_s0 = smov 256   ;;  %s1705_s22 = smov 16  }
  0x23   :  { %61 = dma.hbm_to_vmem [thread:$0]  %s2227_s10, 16384, %s56_s18, [#allocation6], %s1704_s0, %s1704_s0, %s1705_s22  }
  0x24   :  { %1694 = dma.done.wait [#allocation3], 512  }
  0x25   :  { %1695 = vsyncadd [#allocation3], 4294966784 }
  0x26   :  { %1696 = dma.done.wait [#allocation6], 16384  }
  0x27   :  { %1697 = vsyncadd [#allocation6], 4294950912  ;;  %v72_v0 = vld [vmem:[#allocation2] sm:$0xff]  ;;  %v74_v1 = vld [vmem:[#allocation2 + $0x10] sm:$0xff]  ;;  %vm595_vm0 = vcmask 7168   ;;  %vm686_vm1 = vcmask 1041409  }
  0x28   :  { %82 = vadd.xlane.f32.xlu0 %v72_v0  ;;  %86 = vadd.xlane.f32.xlu1 %v74_v1  ;;  %v73_v2 = vld [vmem:[#allocation2 + $0x8] sm:$0xff]  ;;  %v75_v3 = vld [vmem:[#allocation2 + $0x18] sm:$0xff]  ;;  %v76_v4 = vld [vmem:[%s2218_s1] sm:$0xff]  ;;  %vm989_vm2 = vcmask 1041408   ;;  %s1708_s0 = smov [#allocation7]  }
  0x29   :  { %v77_v5 = vld [vmem:[%s2218_s1 + $0x8] sm:$0xff]  ;;  %v78_v6 = vld [vmem:[%s2218_s1 + $0x10] sm:$0xff]  ;;  %v79_v7 = vld [vmem:[%s2218_s1 + $0x18] sm:$0xff]  ;;  %s1176_s28 = sshll.u32 %s1708_s0, 4  ;;  %s1177_s28 = int_to_ptr.vmem [resolvable:$true] %s1176_s28 }
  0x2a   :  { %v80_v8 = vld [vmem:[%s2218_s1 + $0x20] sm:$0xff]  ;;  %v81_v9 = vld [vmem:[%s2218_s1 + $0x28] sm:$0xff]  ;;  %v223_v12 = vld [vmem:[%s2225_s8 + $0x10] sm:$0xff]  ;;  %p1677_p3 = scmp.lt.s32.totalorder %s1177_s28, %s1177_s28 }
  0x2b   :  { %v221_v10 = vld [vmem:[%s2225_s8] sm:$0xff]  ;;  %v222_v11 = vld [vmem:[%s2225_s8 + $0x8] sm:$0xff]  ;;  %v224_v14 = vld [vmem:[%s2225_s8 + $0x18] sm:$0xff] }
  0x2c   :  { %84 = vadd.xlane.f32.xlu0 %v73_v2  ;;  %88 = vadd.xlane.f32.xlu1 %v75_v3  ;;  %v1358_v13 = vpack.c.bf16 %v222_v11, %v221_v10  ;;  %v1362_v15 = vpack.c.bf16 %v224_v14, %v223_v12  ;;  %v225_v52 = vld [vmem:[%s2225_s8 + $0x20] sm:$0xff]  ;;  %v226_v53 = vld [vmem:[%s2225_s8 + $0x28] sm:$0xff]  ;;  %v227_v59 = vld [vmem:[%s2225_s8 + $0x30] sm:$0xff] }
  0x2d   :  { %v1366_v56 = vpack.c.bf16 %v226_v53, %v225_v52  ;;  %v228_v60 = vld [vmem:[%s2225_s8 + $0x38] sm:$0xff]  ;;  %v229_v62 = vld [vmem:[%s2225_s8 + $0x40] sm:$0xff]  ;;  %v230_v63 = vld [vmem:[%s2225_s8 + $0x48] sm:$0xff] }
  0x2e   :  { %1359 = vmatprep.subr.bf16.mxu1 %v1358_v13  ;;  %v1370_v61 = vpack.c.bf16 %v228_v60, %v227_v59  ;;  %v345_v10 = vld [vmem:[%s2226_s9] sm:$0xff]  ;;  %v346_v11 = vld [vmem:[%s2226_s9 + $0x8] sm:$0xff]  ;;  %v708_v53 = vld [vmem:[#allocation5 + $0x38] sm:$0xff] }
  0x2f   :  { %1361 = vmatpush3.bf16.msra.mxu1 %v1358_v13  ;;  %v1912_v12 = vpack.c.bf16 %v346_v11, %v345_v10  ;;  %v481_v13 = vld [vmem:[%s2219_s2] sm:$0xff]  ;;  %v482_v14 = vld [vmem:[%s2219_s2 + $0x8] sm:$0xff]  ;;  %v707_v60 = vld [vmem:[#allocation5 + $0x30] sm:$0xff] }
  0x30   :  { %143 = vadd.xlane.f32.xlu0 %v76_v4  ;;  %145 = vadd.xlane.f32.xlu1 %v77_v5  ;;  %v706_v52 = vld [vmem:[#allocation5 + $0x28] sm:$0xff]  ;;  %v711_v10 = vld [vmem:[#allocation5 + $0x50] sm:$0xff] }
  0x31   :  { %1363 = vmatprep.subr.bf16.mxu1 %v1362_v15  ;;  %v1426_v59 = vpack.c.bf16 %v708_v53, %v706_v52  ;;  %v722_v53 = vld [vmem:[#allocation5 + $0xa8] sm:$0xff] }
  0x33   :  { %1365 = vmatpush3.bf16.msra.mxu1 %v1362_v15  ;;  %v483_v15 = vld [vmem:[%s2219_s2 + $0x10] sm:$0xff] }
  0x34   :  { %147 = vadd.xlane.f32.xlu0 %v78_v6  ;;  %149 = vadd.xlane.f32.xlu1 %v79_v7 }
  0x35   :  { %1367 = vmatprep.subr.bf16.mxu1 %v1366_v56 }
  0x37   :  { %1369 = vmatpush3.bf16.msra.mxu1 %v1366_v56  ;;  %v705_v56 = vld [vmem:[#allocation5 + $0x20] sm:$0xff] }
  0x38   :  { %151 = vadd.xlane.f32.xlu0 %v80_v8  ;;  %153 = vadd.xlane.f32.xlu1 %v81_v9 }
  0x39   :  { %1371 = vmatprep.subr.bf16.mxu1 %v1370_v61 }
  0x3b   :  { %1373 = vmatpush3.bf16.msra.mxu1 %v1370_v61 }
  0xb5   :  { %v83_v16 = vpop.xlane.xlu0 %82  ;;  %v87_v17 = vpop.xlane.xlu1 %86 }
  0xb6   :  { %v91_v18 = vmul.f32 0.0078125, %v83_v16  ;;  %v93_v19 = vmul.f32 0.0078125, %v87_v17  ;;  %v1706_v16 = vmov 0   ;;  %v596_v17 = vsel %vm595_vm0, %v481_v13, 0.0 }
  0xb7   :  { %1597 = vset.pattern.permute.xlu1 %v1706_v16  ;;  %1596 = vset.pattern.permute.xlu0 %v1706_v16 }
  0xb8   :  { %v1830_v20 = vsub.f32 %v72_v0, %v91_v18  ;;  %v1832_v21 = vsub.f32 %v74_v1, %v93_v19  ;;  %v1374_v0 = vpack.c.bf16 %v230_v63, %v229_v62  ;;  %v231_v1 = vld [vmem:[%s2225_s8 + $0x50] sm:$0xff]  ;;  %v597_v18 = vsel %vm595_vm0, %v482_v14, 0.0 }
  0xb9   :  { %v85_v22 = vpop.xlane.xlu0 %84  ;;  %v89_v23 = vpop.xlane.xlu1 %88  ;;  %v605_v19 = vsel %vm595_vm0, %v483_v15, 0.0 }
  0xba   :  { %v92_v24 = vmul.f32 0.0078125, %v85_v22  ;;  %v99_v25 = vmul.f32 %v1830_v20, %v1830_v20  ;;  %v94_v26 = vmul.f32 0.0078125, %v89_v23  ;;  %v101_v29 = vmul.f32 %v1832_v21, %v1832_v21  ;;  %1375 = vmatprep.subr.bf16.mxu1 %v1374_v0  ;;  %v484_v22 = vld [vmem:[%s2219_s2 + $0x18] sm:$0xff]  ;;  %v1933_v23 = vld [vmem:[%s2220_s3] sm:$0xff] }
  0xbb   :  { %1377 = vmatpush3.bf16.msra.mxu1 %v1374_v0 }
  0xbc   :  { %v1836_v27 = vsub.f32 %v73_v2, %v92_v24  ;;  %103 = vadd.xlane.f32.xlu0 %v99_v25  ;;  %v1838_v28 = vsub.f32 %v75_v3, %v94_v26  ;;  %v232_v2 = vld [vmem:[%s2225_s8 + $0x58] sm:$0xff]  ;;  %v1938_v24 = vld [vmem:[%s2220_s3 + $0x8] sm:$0xff]  ;;  %v598_v25 = vadd.f32 %v597_v18, %v596_v17  ;;  %v606_v26 = vsel %vm595_vm0, %v484_v22, 0.0 }
  0xbd   :  { %v144_v30 = vpop.xlane.xlu0 %143  ;;  %v146_v31 = vpop.xlane.xlu1 %145  ;;  %v1378_v3 = vpack.c.bf16 %v232_v2, %v231_v1  ;;  %v1428_v1 = vpack.c.bf16 %v707_v60, %v705_v56  ;;  %v724_v56 = vld [vmem:[#allocation5 + $0xb8] sm:$0xff]  ;;  %v723_v60 = vld [vmem:[#allocation5 + $0xb0] sm:$0xff] }
  0xbe   :  { %v155_v32 = vmul.f32 0.0078125, %v144_v30  ;;  %v100_v33 = vmul.f32 %v1836_v27, %v1836_v27  ;;  %v156_v34 = vmul.f32 0.0078125, %v146_v31  ;;  %v102_v37 = vmul.f32 %v1838_v28, %v1838_v28  ;;  %v489_v30 = vld [vmem:[%s2220_s3 + $0x20] sm:$0xff] }
  0xbf   :  { %1379 = vmatprep.subr.bf16.mxu1 %v1378_v3  ;;  %v607_v31 = vadd.f32 %v606_v26, %v605_v19 }
  0xc0   :  { %v1844_v35 = vsub.f32 %v76_v4, %v155_v32  ;;  %107 = vadd.xlane.f32.xlu0 %v101_v29  ;;  %105 = vadd.xlane.f32.xlu1 %v100_v33  ;;  %v1846_v36 = vsub.f32 %v77_v5, %v156_v34  ;;  %v233_v4 = vld [vmem:[%s2225_s8 + $0x60] sm:$0xff]  ;;  %v234_v5 = vld [vmem:[%s2225_s8 + $0x68] sm:$0xff]  ;;  %v1944_v29 = vld [vmem:[%s2220_s3 + $0x18] sm:$0xff]  ;;  %v646_v32 = vsel %vm595_vm0, %v1933_v23, 0.0  ;;  %v647_v33 = vsel %vm595_vm0, %v1938_v24, 0.0 }
  0xc1   :  { %v148_v38 = vpop.xlane.xlu0 %147  ;;  %v150_v39 = vpop.xlane.xlu1 %149  ;;  %1381 = vmatpush3.bf16.msra.mxu1 %v1378_v3  ;;  %v657_v34 = vsel %vm595_vm0, %v1944_v29, 0.0 }
  0xc2   :  { %v157_v40 = vmul.f32 0.0078125, %v148_v38  ;;  %v167_v41 = vmul.f32 %v1844_v35, %v1844_v35  ;;  %v158_v42 = vmul.f32 0.0078125, %v150_v39  ;;  %v168_v45 = vmul.f32 %v1846_v36, %v1846_v36  ;;  %v702_v38 = vld [vmem:[#allocation5 + $0x8] sm:$0xff]  ;;  %v704_v39 = vld [vmem:[#allocation5 + $0x18] sm:$0xff] }
  0xc4   :  { %v1852_v43 = vsub.f32 %v78_v6, %v157_v40  ;;  %109 = vadd.xlane.f32.xlu1 %v102_v37  ;;  %173 = vadd.xlane.f32.xlu0 %v167_v41  ;;  %v1854_v44 = vsub.f32 %v79_v7, %v158_v42  ;;  %v1382_v6 = vpack.c.bf16 %v234_v5, %v233_v4  ;;  %v235_v7 = vld [vmem:[%s2225_s8 + $0x70] sm:$0xff]  ;;  %v490_v37 = vld [vmem:[%s2220_s3 + $0x28] sm:$0xff]  ;;  %v599_v40 = vrot.slane %v598_v25, 4  ;;  %v712_v5 = vld [vmem:[#allocation5 + $0x58] sm:$0xff] }
  0xc5   :  { %v152_v46 = vpop.xlane.xlu0 %151  ;;  %v154_v47 = vpop.xlane.xlu1 %153  ;;  %v1961_v41 = vld [vmem:[%s2220_s3 + $0x10] sm:$0xff]  ;;  %v658_v42 = vsel %vm595_vm0, %v489_v30, 0.0  ;;  %v710_v4 = vld [vmem:[#allocation5 + $0x48] sm:$0xff] }
  0xc6   :  { %v159_v48 = vmul.f32 0.0078125, %v152_v46  ;;  %v169_v49 = vmul.f32 %v1852_v43, %v1852_v43  ;;  %v160_v50 = vmul.f32 0.0078125, %v154_v47  ;;  %v170_v51 = vmul.f32 %v1854_v44, %v1854_v44  ;;  %1383 = vmatprep.subr.bf16.mxu1 %v1382_v6  ;;  %v701_v47 = vld [vmem:[#allocation5] sm:$0xff] }
  0xc7   :  { %1385 = vmatpush3.bf16.msra.mxu1 %v1382_v6  ;;  %v1422_v46 = vpack.c.bf16 %v704_v39, %v702_v38  ;;  %v649_v62 = vsel %vm595_vm0, %v1961_v41, 0.0  ;;  %v709_v6 = vld [vmem:[#allocation5 + $0x40] sm:$0xff] }
  0xc8   :  { %v1868_v54 = vsub.f32 %v80_v8, %v159_v48  ;;  %175 = vadd.xlane.f32.xlu1 %v168_v45  ;;  %177 = vadd.xlane.f32.xlu0 %v169_v49  ;;  %v1870_v55 = vsub.f32 %v81_v9, %v160_v50  ;;  %v236_v8 = vld [vmem:[%s2225_s8 + $0x78] sm:$0xff]  ;;  %v660_v45 = vsel %vm595_vm0, %v490_v37, 0.0  ;;  %v703_v48 = vld [vmem:[#allocation5 + $0x10] sm:$0xff]  ;;  %v608_v49 = vrot.slane %v607_v31, 4 }
  0xc9   :  { %v1386_v9 = vpack.c.bf16 %v236_v8, %v235_v7  ;;  %v659_v50 = vadd.f32 %v658_v42, %v657_v34  ;;  %1423 = vmatprep.subr.bf16.mxu0 %v1422_v46  ;;  %v716_v34 = vld [vmem:[#allocation5 + $0x78] sm:$0xff] }
  0xca   :  { %v171_v57 = vmul.f32 %v1868_v54, %v1868_v54  ;;  %v172_v58 = vmul.f32 %v1870_v55, %v1870_v55  ;;  %v609_v61 = vadd.f32 %v608_v49, %v607_v31  ;;  %v717_v49 = vld [vmem:[#allocation5 + $0x80] sm:$0xff] }
  0xcb   :  { %1387 = vmatprep.subr.bf16.mxu1 %v1386_v9  ;;  %v661_v63 = vadd.f32 %v660_v45, %v659_v50 }
  0xcc   :  { %179 = vadd.xlane.f32.xlu1 %v170_v51  ;;  %181 = vadd.xlane.f32.xlu0 %v171_v57  ;;  %v1424_v51 = vpack.c.bf16 %v703_v48, %v701_v47  ;;  %v600_v57 = vadd.f32 %v599_v40, %v598_v25  ;;  %v610_v2 = vrot.slane %v609_v61, 2  ;;  %v715_v40 = vld [vmem:[#allocation5 + $0x70] sm:$0xff]  ;;  %v718_v47 = vld [vmem:[#allocation5 + $0x88] sm:$0xff]  ;;  %v720_v48 = vld [vmem:[#allocation5 + $0x98] sm:$0xff] }
  0xcd   :  { %1389 = vmatpush3.bf16.msra.mxu1 %v1386_v9  ;;  %v662_v3 = vrot.slane %v661_v63, 4  ;;  %v1430_v9 = vpack.c.bf16 %v712_v5, %v710_v4  ;;  %v1438_v50 = vpack.c.bf16 %v720_v48, %v718_v47  ;;  %v730_v5 = vld [vmem:[#allocation5 + $0xe8] sm:$0xff] }
  0xce   :  { %1391 = vmatprep.subr.bf16.mxu1 %v1912_v12  ;;  %v601_v0 = vrot.slane %v600_v57, 2  ;;  %1425 = vmatpush1.bf16.msra.mxu0 %v1424_v51  ;;  %v611_v11 = vadd.f32 %v610_v2, %v609_v61  ;;  %v719_v51 = vld [vmem:[#allocation5 + $0x90] sm:$0xff] }
  0xcf   :  { %1427 = vmatprep.subr.bf16.mxu0 %v1426_v59  ;;  %v1440_v52 = vpack.c.bf16 %v719_v51, %v717_v49  ;;  %v1442_v59 = vpack.c.bf16 %v724_v56, %v722_v53  ;;  %v348_v56 = vld [vmem:[%s2226_s9 + $0x18] sm:$0xff] }
  0xd0   :  { %183 = vadd.xlane.f32.xlu1 %v172_v58  ;;  %v648_v58 = vadd.f32 %v647_v33, %v646_v32  ;;  %v602_v7 = vadd.f32 %v601_v0, %v600_v57  ;;  %v612_v16 = vrot.slane %v611_v11, 1  ;;  %v714_v33 = vld [vmem:[#allocation5 + $0x68] sm:$0xff]  ;;  %v721_v57 = vld [vmem:[#allocation5 + $0xa0] sm:$0xff] }
  0xd1   :  { %v1434_v39 = vpack.c.bf16 %v716_v34, %v714_v33  ;;  %v1444_v61 = vpack.c.bf16 %v723_v60, %v721_v57  ;;  %v725_v0 = vld [vmem:[#allocation5 + $0xc0] sm:$0xff] }
  0xd2   :  { %v650_v8 = vadd.f32 %v649_v62, %v648_v58  ;;  %1429 = vmatpush1.bf16.msra.mxu0 %v1428_v1  ;;  %v613_v25 = vadd.f32 %v612_v16, %v611_v11  ;;  %v726_v62 = vld [vmem:[#allocation5 + $0xc8] sm:$0xff]  ;;  %v735_v16 = vld [vmem:[#allocation5 + $0x110] sm:$0xff] }
  0xd3   :  { %1431 = vmatprep.subr.bf16.mxu0 %v1430_v9  ;;  %v731_v9 = vld [vmem:[#allocation5 + $0xf0] sm:$0xff]  ;;  %v734_v11 = vld [vmem:[#allocation5 + $0x108] sm:$0xff] }
  0xd4   :  { %v651_v19 = vrot.slane %v650_v8, 4  ;;  %v615_v31 = vadd.f32 1e-08, %v613_v25 }
  0xd6   :  { %v652_v32 = vadd.f32 %v651_v19, %v650_v8 }
  0xd8   :  { %v653_v46 = vrot.slane %v652_v32, 2 }
  0xda   :  { %v654_v58 = vadd.f32 %v653_v46, %v652_v32  ;;  %v1980_v46 = vld [vmem:[%s2223_s6 + $0x1] ss:$0 sm:$0xff] }
  0xdc   :  { %v655_v1 = vrot.slane %v654_v58, 1 }
  0xe1   :  { %498 = vperm.xlu1 %1597, %v482_v14   ;;  %v603_v14 = vrot.slane %v602_v7, 1 }
  0xe2   :  { %493 = vperm.xlu0 %1596, %v481_v13   ;;  %v663_v13 = vadd.f32 %v662_v3, %v661_v63  ;;  %v728_v63 = vld [vmem:[#allocation5 + $0xd8] sm:$0xff]  ;;  %v727_v3 = vld [vmem:[#allocation5 + $0xd0] sm:$0xff] }
  0xe3   :  { %v604_v18 = vadd.f32 %v603_v14, %v602_v7  ;;  %v1446_v2 = vpack.c.bf16 %v728_v63, %v726_v62  ;;  %v1448_v4 = vpack.c.bf16 %v727_v3, %v725_v0  ;;  %v656_v7 = vadd.f32 %v655_v1, %v654_v58  ;;  %v349_v1 = vld [vmem:[%s2226_s9 + $0x20] sm:$0xff] }
  0xe4   :  { %v664_v17 = vrot.slane %v663_v13, 2 }
  0xe5   :  { %503 = vperm.xlu1 %1597, %v483_v15   ;;  %v1432_v15 = vpack.c.bf16 %v711_v10, %v709_v6  ;;  %v732_v6 = vld [vmem:[#allocation5 + $0xf8] sm:$0xff]  ;;  %v668_v14 = vadd.f32 1e-08, %v656_v7 }
  0xe6   :  { %537 = vperm.xlu0 %1596, %v489_v30   ;;  %v665_v26 = vadd.f32 %v664_v17, %v663_v13  ;;  %v614_v30 = vadd.f32 1e-08, %v604_v18  ;;  %v1450_v8 = vpack.c.bf16 %v732_v6, %v730_v5  ;;  %v736_v13 = vld [vmem:[#allocation5 + $0x118] sm:$0xff] }
  0xe7   :  { %1433 = vmatpush1.bf16.msra.mxu0 %v1432_v15  ;;  %v1454_v15 = vpack.c.bf16 %v736_v13, %v734_v11 }
  0xe8   :  { %1435 = vmatprep.subr.bf16.mxu0 %v1434_v39 }
  0xe9   :  { %508 = vperm.xlu1 %1597, %v484_v22   ;;  %v666_v22 = vrot.slane %v665_v26, 1 }
  0xea   :  { %542 = vperm.xlu0 %1596, %v490_v37   ;;  %v713_v37 = vld [vmem:[#allocation5 + $0x60] sm:$0xff] }
  0xeb   :  { %v667_v38 = vadd.f32 %v666_v22, %v665_v26  ;;  %v1436_v42 = vpack.c.bf16 %v715_v40, %v713_v37 }
  0xed   :  { %618 = vperm.xlu1 %1597, %v614_v30   ;;  %v669_v45 = vadd.f32 1e-08, %v667_v38  ;;  %1437 = vmatpush1.bf16.msra.mxu0 %v1436_v42  ;;  %v1974_v42 = vld [vmem:[%s2223_s6] ss:$0 sm:$0xff] }
  0xee   :  { %1439 = vmatprep.subr.bf16.mxu0 %v1438_v50 }
  0xef   :  { %677 = vperm.xlu0 %1596, %v669_v45  }
  0xf1   :  { %623 = vperm.xlu1 %1597, %v615_v31   ;;  %1441 = vmatpush1.bf16.msra.mxu0 %v1440_v52 }
  0xf2   :  { %1443 = vmatprep.subr.bf16.mxu0 %v1442_v59 }
  0xf5   :  { %517 = vperm.xlu1 %1597, %v1933_v23   ;;  %1445 = vmatpush1.bf16.msra.mxu0 %v1444_v61  ;;  %v729_v23 = vld [vmem:[#allocation5 + $0xe0] sm:$0xff] }
  0xf6   :  { %1447 = vmatprep.subr.bf16.mxu0 %v1446_v2  ;;  %v1452_v10 = vpack.c.bf16 %v731_v9, %v729_v23  ;;  %v350_v2 = vld [vmem:[%s2226_s9 + $0x28] sm:$0xff]  ;;  %v351_v9 = vld [vmem:[%s2226_s9 + $0x30] sm:$0xff] }
  0xf7   :  { %v1398_v23 = vpack.c.bf16 %v350_v2, %v349_v1  ;;  %v744_v1 = vld [vmem:[#allocation5 + $0x158] sm:$0xff] }
  0xf9   :  { %522 = vperm.xlu1 %1597, %v1938_v24   ;;  %1449 = vmatpush1.bf16.msra.mxu0 %v1448_v4  ;;  %v733_v24 = vld [vmem:[#allocation5 + $0x100] sm:$0xff] }
  0xfa   :  { %1451 = vmatprep.subr.bf16.mxu0 %v1450_v8  ;;  %v1456_v17 = vpack.c.bf16 %v735_v16, %v733_v24  ;;  %v353_v16 = vld [vmem:[%s2226_s9 + $0x40] sm:$0xff] }
  0xfd   :  { %532 = vperm.xlu1 %1597, %v1944_v29   ;;  %1453 = vmatpush1.bf16.msra.mxu0 %v1452_v10  ;;  %v352_v10 = vld [vmem:[%s2226_s9 + $0x38] sm:$0xff] }
  0xfe   :  { %1455 = vmatprep.subr.bf16.mxu0 %v1454_v15  ;;  %v1402_v15 = vpack.c.bf16 %v352_v10, %v351_v9  ;;  %v749_v10 = vld [vmem:[#allocation5 + $0x180] sm:$0xff] }
 0x101   :  { %527 = vperm.xlu1 %1597, %v1961_v41   ;;  %1457 = vmatpush1.bf16.msra.mxu0 %v1456_v17  ;;  %v354_v17 = vld [vmem:[%s2226_s9 + $0x48] sm:$0xff] }
 0x105   :  { %672 = vperm.xlu1 %1597, %v668_v14  }
 0x149   :  { %v104_v29 = vpop.xlane.xlu0 %103 }
 0x14a   :  { %v111_v18 = vmul.f32 0.0078125, %v104_v29 }
 0x14c   :  { %v115_v19 = vadd.f32 1e-05, %v111_v18 }
 0x14d   :  { %v106_v25 = vpop.xlane.xlu1 %105  ;;  %v108_v26 = vpop.xlane.xlu0 %107 }
 0x14e   :  { %1598 = vrsqrt.f32 %v115_v19  ;;  %v112_v30 = vmul.f32 0.0078125, %v106_v25  ;;  %v113_v22 = vmul.f32 0.0078125, %v108_v26  ;;  %v1406_v25 = vpack.c.bf16 %v354_v17, %v353_v16  ;;  %v355_v26 = vld [vmem:[%s2226_s9 + $0x50] sm:$0xff]  ;;  %v758_v17 = vld [vmem:[#allocation5 + $0x1c8] sm:$0xff] }
 0x14f   :  { %v755_v16 = vld [vmem:[#allocation5 + $0x1b0] sm:$0xff] }
 0x150   :  { %v116_v31 = vadd.f32 1e-05, %v112_v30  ;;  %v117_v32 = vadd.f32 1e-05, %v113_v22  ;;  %v356_v30 = vld [vmem:[%s2226_s9 + $0x58] sm:$0xff] }
 0x151   :  { %v110_v33 = vpop.xlane.xlu1 %109  ;;  %v174_v41 = vpop.xlane.xlu0 %173 }
 0x152   :  { %1600 = vrsqrt.f32 %v116_v31  ;;  %v114_v34 = vmul.f32 0.0078125, %v110_v33  ;;  %v185_v37 = vmul.f32 0.0078125, %v174_v41  ;;  %v1410_v31 = vpack.c.bf16 %v356_v30, %v355_v26  ;;  %v358_v33 = vld [vmem:[%s2226_s9 + $0x68] sm:$0xff] }
 0x153   :  { %1602 = vrsqrt.f32 %v117_v32  ;;  %v357_v32 = vld [vmem:[%s2226_s9 + $0x60] sm:$0xff]  ;;  %v762_v30 = vld [vmem:[#allocation5 + $0x1e8] sm:$0xff] }
 0x154   :  { %v118_v38 = vadd.f32 1e-05, %v114_v34  ;;  %v191_v39 = vadd.f32 1e-05, %v185_v37  ;;  %v1414_v41 = vpack.c.bf16 %v358_v33, %v357_v32  ;;  %v359_v37 = vld [vmem:[%s2226_s9 + $0x70] sm:$0xff]  ;;  %v761_v33 = vld [vmem:[#allocation5 + $0x1e0] sm:$0xff] }
 0x155   :  { %v176_v50 = vpop.xlane.xlu1 %175  ;;  %v178_v59 = vpop.xlane.xlu0 %177 }
 0x156   :  { %1604 = vrsqrt.f32 %v118_v38  ;;  %v186_v5 = vmul.f32 0.0078125, %v176_v50  ;;  %v187_v6 = vmul.f32 0.0078125, %v178_v59  ;;  %v360_v38 = vld [vmem:[%s2226_s9 + $0x78] sm:$0xff] }
 0x157   :  { %1606 = vrsqrt.f32 %v191_v39 }
 0x158   :  { %v1599_v40 = vpop.eup %1598  ;;  %v193_v13 = vadd.f32 1e-05, %v187_v6  ;;  %v745_v6 = vld [vmem:[#allocation5 + $0x160] sm:$0xff] }
 0x159   :  { %v123_v45 = vmul.f32 %v1599_v40, %v1830_v20  ;;  %v347_v20 = vld [vmem:[%s2226_s9 + $0x10] sm:$0xff]  ;;  %v180_v3 = vpop.xlane.xlu1 %179  ;;  %v182_v7 = vpop.xlane.xlu0 %181 }
 0x15a   :  { %v1394_v62 = vpack.c.bf16 %v348_v56, %v347_v20  ;;  %v188_v11 = vmul.f32 0.0078125, %v180_v3  ;;  %v189_v24 = vmul.f32 0.0078125, %v182_v7  ;;  %v741_v3 = vld [vmem:[#allocation5 + $0x140] sm:$0xff]  ;;  %v750_v7 = vld [vmem:[#allocation5 + $0x188] sm:$0xff] }
 0x15b   :  { %v131_v47 = vmul.f32 %v1974_v42, %v123_v45  ;;  %v1418_v45 = vpack.c.bf16 %v360_v38, %v359_v37  ;;  %v766_v37 = vld [vmem:[#allocation5 + $0x208] sm:$0xff]  ;;  %v768_v38 = vld [vmem:[#allocation5 + $0x218] sm:$0xff] }
 0x15c   :  { %v1601_v48 = vpop.eup %1600  ;;  %v194_v29 = vadd.f32 1e-05, %v188_v11  ;;  %v195_v19 = vadd.f32 1e-05, %v189_v24  ;;  %v756_v24 = vld [vmem:[#allocation5 + $0x1b8] sm:$0xff] }
 0x15d   :  { %v1603_v49 = vpop.eup %1602  ;;  %v139_v51 = vadd.f32 %v1980_v46, %v131_v47  ;;  %v124_v52 = vmul.f32 %v1601_v48, %v1836_v27  ;;  %v184_v14 = vpop.xlane.xlu1 %183 }
 0x15e   :  { %v125_v53 = vmul.f32 %v1603_v49, %v1832_v21  ;;  %v190_v18 = vmul.f32 0.0078125, %v184_v14 }
 0x15f   :  { %1311 = vmatprep.mubr.f32.mxu1 %v139_v51  ;;  %v132_v57 = vmul.f32 %v1974_v42, %v124_v52 }
 0x160   :  { %v1605_v58 = vpop.eup %1604  ;;  %v133_v60 = vmul.f32 %v1974_v42, %v125_v53  ;;  %v196_v22 = vadd.f32 1e-05, %v190_v18  ;;  %v760_v18 = vld [vmem:[#allocation5 + $0x1d8] sm:$0xff] }
 0x161   :  { %v1607_v61 = vpop.eup %1606  ;;  %v140_v27 = vadd.f32 %v1980_v46, %v132_v57  ;;  %v126_v21 = vmul.f32 %v1605_v58, %v1838_v28  ;;  %v1478_v26 = vpack.c.bf16 %v760_v18, %v758_v17 }
 0x162   :  { %v141_v63 = vadd.f32 %v1980_v46, %v133_v60  ;;  %v203_v0 = vmul.f32 %v1607_v61, %v1844_v35  ;;  %v738_v61 = vld [vmem:[#allocation5 + $0x128] sm:$0xff] }
 0x163   :  { %1312 = vmatmul.mubr.f32.vlgmr.msra.gmra.mrb[0].mxu1 %v140_v27  ;;  %v134_v4 = vmul.f32 %v1974_v42, %v126_v21  ;;  %v740_v27 = vld [vmem:[#allocation5 + $0x138] sm:$0xff]  ;;  %v739_v21 = vld [vmem:[#allocation5 + $0x130] sm:$0xff] }
 0x164   :  { %1393 = vmatpush3.bf16.msra.mxu1 %v1912_v12  ;;  %1314 = vmatprep.mubr.f32.mxu1 %v141_v63  ;;  %v209_v28 = vmul.f32 %v1974_v42, %v203_v0  ;;  %v192_v12 = vadd.f32 1e-05, %v186_v5  ;;  %v742_v0 = vld [vmem:[#allocation5 + $0x148] sm:$0xff] }
 0x165   :  { %1395 = vmatprep.subr.bf16.mxu1 %v1394_v62  ;;  %v142_v35 = vadd.f32 %v1980_v46, %v134_v4  ;;  %v1462_v2 = vpack.c.bf16 %v744_v1, %v742_v0  ;;  %v746_v5 = vld [vmem:[#allocation5 + $0x168] sm:$0xff] }
 0x166   :  { %v215_v8 = vadd.f32 %v1980_v46, %v209_v28  ;;  %1608 = vrsqrt.f32 %v192_v12  ;;  %v748_v28 = vld [vmem:[#allocation5 + $0x178] sm:$0xff]  ;;  %v751_v12 = vld [vmem:[#allocation5 + $0x190] sm:$0xff] }
 0x167   :  { %1315 = vmatmul.mubr.f32.gmra.mrb[2].mxu1 %v142_v35  ;;  %1610 = vrsqrt.f32 %v193_v13  ;;  %v747_v35 = vld [vmem:[#allocation5 + $0x170] sm:$0xff]  ;;  %v1472_v11 = vpack.c.bf16 %v751_v12, %v749_v10  ;;  %v754_v13 = vld [vmem:[#allocation5 + $0x1a8] sm:$0xff] }
 0x168   :  { %1397 = vmatpush3.bf16.msra.mxu1 %v1394_v62  ;;  %1349 = vmatprep.mubr.f32.mxu1 %v215_v8  ;;  %1612 = vrsqrt.f32 %v194_v29  ;;  %v737_v62 = vld [vmem:[#allocation5 + $0x120] sm:$0xff]  ;;  %v752_v8 = vld [vmem:[#allocation5 + $0x198] sm:$0xff]  ;;  %v1474_v14 = vpack.c.bf16 %v756_v24, %v754_v13 }
 0x169   :  { %1399 = vmatprep.subr.bf16.mxu1 %v1398_v23  ;;  %1614 = vrsqrt.f32 %v195_v19  ;;  %v1460_v63 = vpack.c.bf16 %v739_v21, %v737_v62  ;;  %v1470_v9 = vpack.c.bf16 %v752_v8, %v750_v7  ;;  %v757_v19 = vld [vmem:[#allocation5 + $0x1c0] sm:$0xff] }
 0x16a   :  { %1616 = vrsqrt.f32 %v196_v22  ;;  %v764_v22 = vld [vmem:[#allocation5 + $0x1f8] sm:$0xff] }
 0x16b   :  { %v1482_v32 = vpack.c.bf16 %v764_v22, %v762_v30  ;;  %v765_v22 = vld [vmem:[#allocation5 + $0x200] sm:$0xff] }
 0x16c   :  { %1401 = vmatpush3.bf16.msra.mxu1 %v1398_v23  ;;  %v1468_v23 = vpack.c.bf16 %v747_v35, %v745_v6 }
 0x16d   :  { %1403 = vmatprep.subr.bf16.mxu1 %v1402_v15 }
 0x170   :  { %1405 = vmatpush3.bf16.msra.mxu1 %v1402_v15  ;;  %v1609_v34 = vpop.eup %1608  ;;  %v753_v15 = vld [vmem:[#allocation5 + $0x1a0] sm:$0xff] }
 0x171   :  { %1407 = vmatprep.subr.bf16.mxu1 %v1406_v25  ;;  %v1611_v39 = vpop.eup %1610  ;;  %v204_v40 = vmul.f32 %v1609_v34, %v1846_v36  ;;  %v1476_v29 = vpack.c.bf16 %v755_v16, %v753_v15 }
 0x172   :  { %v1613_v47 = vpop.eup %1612  ;;  %v205_v48 = vmul.f32 %v1611_v39, %v1852_v43  ;;  %v1486_v39 = vpack.c.bf16 %v768_v38, %v766_v37 }
 0x173   :  { %v1615_v49 = vpop.eup %1614  ;;  %v210_v50 = vmul.f32 %v1974_v42, %v204_v40  ;;  %v206_v51 = vmul.f32 %v1613_v47, %v1854_v44  ;;  %v499_v40 = vpop.permute.xlu1 %498  ;;  %v1191_v47 = vld [vmem:[%s2223_s6 + $0x2] ss:$0 sm:$0xff] }
 0x174   :  { %1409 = vmatpush3.bf16.msra.mxu1 %v1406_v25  ;;  %v1617_v52 = vpop.eup %1616  ;;  %v211_v53 = vmul.f32 %v1974_v42, %v205_v48  ;;  %v207_v20 = vmul.f32 %v1615_v49, %v1868_v54  ;;  %v759_v25 = vld [vmem:[#allocation5 + $0x1d0] sm:$0xff]  ;;  %v1192_v49 = vld [vmem:[%s2221_s4] ss:$0 sm:$0xff] }
 0x175   :  { %1411 = vmatprep.subr.bf16.mxu1 %v1410_v31  ;;  %v216_v36 = vadd.f32 %v1980_v46, %v210_v50  ;;  %v212_v56 = vmul.f32 %v1974_v42, %v206_v51  ;;  %v208_v57 = vmul.f32 %v1617_v52, %v1870_v55  ;;  %v1458_v55 = vpack.c.bf16 %v740_v27, %v738_v61 }
 0x176   :  { %v217_v43 = vadd.f32 %v1980_v46, %v211_v53  ;;  %v213_v58 = vmul.f32 %v1974_v42, %v207_v20 }
 0x177   :  { %v218_v44 = vadd.f32 %v1980_v46, %v212_v56  ;;  %v214_v59 = vmul.f32 %v1974_v42, %v208_v57  ;;  %1459 = vmatprep.subr.bf16.mxu0 %v1458_v55  ;;  %v743_v42 = vld [vmem:[#allocation5 + $0x150] sm:$0xff]  ;;  %v1193_v57 = vld [vmem:[%s2221_s4 + $0x1] ss:$0 sm:$0xff]  ;;  %s1672_s4 = scalar_lea.vmem %s1177_s28, 32 }
 0x178   :  { %1413 = vmatpush3.bf16.msra.mxu1 %v1410_v31  ;;  %v219_v60 = vadd.f32 %v1980_v46, %v213_v58  ;;  %1461 = vmatpush1.bf16.msra.mxu0 %v1460_v63  ;;  %v1464_v4 = vpack.c.bf16 %v743_v42, %v741_v3  ;;  %v1480_v31 = vpack.c.bf16 %v759_v25, %v757_v19  ;;  %p1673_p2 = scmp.ne.s32.totalorder %s1177_s28, %s1672_s4  ;;  %p1678_p4 = scmp.lt.s32.totalorder %s1672_s4, %s1672_s4 }
 0x179   :  { %1415 = vmatprep.subr.bf16.mxu1 %v1414_v41  ;;  %v220_v54 = vadd.f32 %v1980_v46, %v214_v59  ;;  %1463 = vmatprep.subr.bf16.mxu0 %v1462_v2  ;;  %v1466_v46 = vpack.c.bf16 %v748_v28, %v746_v5 }
 0x17a   :  { %p1679_p5 = por %p1678_p4, %p1677_p3 }
 0x17c   :  { %1417 = vmatpush3.bf16.msra.mxu1 %v1414_v41  ;;  %1465 = vmatpush1.bf16.msra.mxu0 %v1464_v4  ;;  %v763_v41 = vld [vmem:[#allocation5 + $0x1f0] sm:$0xff]  ;;  %p1680_p6 = pnand %p1679_p5, %p1673_p2 }
 0x17d   :  { %1419 = vmatprep.subr.bf16.mxu1 %v1418_v45  ;;  %1467 = vmatprep.subr.bf16.mxu0 %v1466_v46  ;;  %v1484_v34 = vpack.c.bf16 %v763_v41, %v761_v33  ;;  %v770_v33 = vld [vmem:[#allocation5 + $0x228] sm:$0xff]  ;;  %v772_v41 = vld [vmem:[#allocation5 + $0x238] sm:$0xff] }
 0x180   :  { %1421 = vmatpush3.bf16.msra.mxu1 %v1418_v45  ;;  %1469 = vmatpush1.bf16.msra.mxu0 %v1468_v23  ;;  %v504_v45 = vpop.permute.xlu1 %503 }
 0x181   :  { %1471 = vmatprep.subr.bf16.mxu0 %v1470_v9 }
 0x183   :  { %1350 = vmatmul.mubr.f32.vlgmr.msra.gmra.mrb[4].mxu1 %v216_v36 }
 0x184   :  { %1352 = vmatprep.mubr.f32.mxu1 %v217_v43  ;;  %1473 = vmatpush1.bf16.msra.mxu0 %v1472_v11  ;;  %v509_v52 = vpop.permute.xlu1 %508  ;;  %v494_v43 = vpop.permute.xlu0 %493 }
 0x185   :  { %1475 = vmatprep.subr.bf16.mxu0 %v1474_v14 }
 0x187   :  { %1353 = vmatmul.mubr.f32.gmra.mrb[6].mxu1 %v218_v44 }
 0x188   :  { %1355 = vmatprep.mubr.f32.mxu1 %v219_v60  ;;  %1477 = vmatpush1.bf16.msra.mxu0 %v1476_v29  ;;  %v619_v27 = vpop.permute.xlu1 %618 }
 0x189   :  { %1479 = vmatprep.subr.bf16.mxu0 %v1478_v26  ;;  %1618 = vrcp.f32 %v619_v27 }
 0x18b   :  { %1356 = vmatmul.mubr.f32.gmra.mrb[8].mxu1 %v220_v54 }
 0x18c   :  { %1481 = vmatpush1.bf16.msra.mxu0 %v1480_v31  ;;  %v624_v28 = vpop.permute.xlu1 %623  ;;  %v767_v31 = vld [vmem:[#allocation5 + $0x210] sm:$0xff] }
 0x18d   :  { %1483 = vmatprep.subr.bf16.mxu0 %v1482_v32  ;;  %1620 = vrcp.f32 %v624_v28  ;;  %v538_v28 = vpop.permute.xlu0 %537 }
 0x190   :  { %1485 = vmatpush1.bf16.msra.mxu0 %v1484_v34  ;;  %v518_v19 = vpop.permute.xlu1 %517 }
 0x191   :  { %1487 = vmatprep.subr.bf16.mxu0 %v1486_v39  ;;  %v1488_v39 = vpack.c.bf16 %v767_v31, %v765_v22 }
 0x193   :  { %v1619_v18 = vpop.eup %1618 }
 0x197   :  { %v1621_v32 = vpop.eup %1620 }
 0x236   :  { %v1313_v48 = vpop.f32.mrb[0].mxu1 }
 0x237   :  { %v314_v50 = vadd.f32 %v1313_v48, %v1191_v47  ;;  %v308_v51 = vpop.f32.mrb[1].mxu1  ;;  %v771_v48 = vld [vmem:[#allocation5 + $0x230] sm:$0xff] }
 0x238   :  { %v309_v53 = vadd.f32 %v1191_v47, %v308_v51  ;;  %v776_v51 = vld [vmem:[#allocation5 + $0x258] sm:$0xff] }
 0x239   :  { %v342_v20 = vadd.f32 %v1192_v49, %v314_v50  ;;  %v774_v50 = vld [vmem:[#allocation5 + $0x248] sm:$0xff] }
 0x23a   :  { %v341_v36 = vadd.f32 %v1192_v49, %v309_v53  ;;  %v1316_v56 = vpop.f32.mrb[2].mxu1  ;;  %v523_v49 = vpop.permute.xlu1 %522 }
 0x23b   :  { %v512_v58 = vmul.f32 %v499_v40, %v342_v20  ;;  %v324_v44 = vadd.f32 %v1316_v56, %v1191_v47  ;;  %v318_v59 = vpop.f32.mrb[3].mxu1  ;;  %v1494_v56 = vpack.c.bf16 %v776_v51, %v774_v50 }
 0x23c   :  { %v511_v60 = vmul.f32 %v494_v43, %v341_v36  ;;  %v319_v54 = vadd.f32 %v1191_v47, %v318_v59  ;;  %v769_v47 = vld [vmem:[#allocation5 + $0x220] sm:$0xff]  ;;  %v775_v43 = vld [vmem:[#allocation5 + $0x250] sm:$0xff]  ;;  %v778_v59 = vld [vmem:[#allocation5 + $0x268] sm:$0xff] }
 0x23d   :  { %v344_v61 = vadd.f32 %v1193_v57, %v324_v44  ;;  %v1492_v53 = vpack.c.bf16 %v771_v48, %v769_v47  ;;  %v1195_v36 = vld [vmem:[%s2222_s5] ss:$0 sm:$0xff] }
 0x23e   :  { %v551_v55 = vmax.f32 %v511_v60, %v512_v58  ;;  %v581_v62 = vadd.f32 %v512_v58, %v511_v60  ;;  %v343_v21 = vadd.f32 %v1193_v57, %v319_v54  ;;  %v773_v57 = vld [vmem:[#allocation5 + $0x240] sm:$0xff]  ;;  %v780_v60 = vld [vmem:[#allocation5 + $0x278] sm:$0xff] }
 0x23f   :  { %v514_v63 = vmul.f32 %v509_v52, %v344_v61  ;;  %v1194_v52 = vld [vmem:[%s2223_s6 + $0x3] ss:$0 sm:$0xff]  ;;  %v533_v61 = vpop.permute.xlu1 %532 }
 0x240   :  { %v552_v0 = vrot.slane %v551_v55, 4  ;;  %v582_v1 = vrot.slane %v581_v62, 4  ;;  %v513_v2 = vmul.f32 %v504_v45, %v343_v21  ;;  %v1490_v45 = vpack.c.bf16 %v772_v41, %v770_v33  ;;  %v785_v33 = vld [vmem:[#allocation5 + $0x2a0] sm:$0xff]  ;;  %v787_v41 = vld [vmem:[#allocation5 + $0x2b0] sm:$0xff] }
 0x242   :  { %v553_v3 = vmax.f32 %v551_v55, %v552_v0  ;;  %v583_v42 = vadd.f32 %v582_v1, %v581_v62  ;;  %v558_v4 = vmax.f32 %v513_v2, %v514_v63  ;;  %v588_v5 = vadd.f32 %v514_v63, %v513_v2  ;;  %v777_v0 = vld [vmem:[#allocation5 + $0x260] sm:$0xff]  ;;  %v779_v1 = vld [vmem:[#allocation5 + $0x270] sm:$0xff] }
 0x243   :  { %v1496_v55 = vpack.c.bf16 %v775_v43, %v773_v57  ;;  %v1498_v63 = vpack.c.bf16 %v780_v60, %v778_v59  ;;  %v794_v43 = vld [vmem:[#allocation5 + $0x2e8] sm:$0xff] }
 0x244   :  { %v559_v46 = vrot.slane %v558_v4, 4  ;;  %v589_v6 = vrot.slane %v588_v5, 4  ;;  %v584_v35 = vrot.slane %v583_v42, 2  ;;  %v554_v23 = vrot.slane %v553_v3, 2 }
 0x246   :  { %v560_v7 = vmax.f32 %v558_v4, %v559_v46  ;;  %v590_v8 = vadd.f32 %v589_v6, %v588_v5  ;;  %v585_v9 = vadd.f32 %v584_v35, %v583_v42  ;;  %v555_v10 = vmax.f32 %v553_v3, %v554_v23  ;;  %v782_v4 = vld [vmem:[#allocation5 + $0x288] sm:$0xff]  ;;  %v784_v5 = vld [vmem:[#allocation5 + $0x298] sm:$0xff]  ;;  %v1196_v6 = vld [vmem:[%s2222_s5 + $0x1] ss:$0 sm:$0xff] }
 0x247   :  { %v1500_v23 = vpack.c.bf16 %v779_v1, %v777_v0 }
 0x248   :  { %v586_v12 = vrot.slane %v585_v9, 1  ;;  %v591_v11 = vrot.slane %v590_v8, 2  ;;  %v561_v13 = vrot.slane %v560_v7, 2  ;;  %v556_v14 = vrot.slane %v555_v10, 1 }
 0x24a   :  { %v592_v24 = vadd.f32 %v591_v11, %v590_v8  ;;  %v562_v15 = vmax.f32 %v560_v7, %v561_v13  ;;  %v587_v16 = vadd.f32 %v586_v12, %v585_v9  ;;  %v557_v26 = vmax.f32 %v555_v10, %v556_v14  ;;  %v781_v12 = vld [vmem:[#allocation5 + $0x280] sm:$0xff]  ;;  %v783_v11 = vld [vmem:[#allocation5 + $0x290] sm:$0xff]  ;;  %v528_v13 = vpop.permute.xlu1 %527 }
 0x24b   :  { %v1502_v10 = vpack.c.bf16 %v784_v5, %v782_v4 }
 0x24c   :  { %v593_v17 = vrot.slane %v592_v24, 1  ;;  %v563_v29 = vrot.slane %v562_v15, 1  ;;  %v627_v34 = vmul.f32 %v1619_v18, %v587_v16  ;;  %v786_v16 = vld [vmem:[#allocation5 + $0x2a8] sm:$0xff] }
 0x24e   :  { %v594_v25 = vadd.f32 %v593_v17, %v592_v24  ;;  %v564_v30 = vmax.f32 %v562_v15, %v563_v29  ;;  %v788_v17 = vld [vmem:[#allocation5 + $0x2b8] sm:$0xff]  ;;  %v673_v50 = vpop.permute.xlu1 %672 }
 0x24f   :  { %1622 = vrcp.f32 %v673_v50 }
 0x250   :  { %v629_v37 = vmul.f32 %v1621_v32, %v594_v25  ;;  %v687_v38 = vsel %vm686_vm1, %v564_v30, %v557_v26  ;;  %v1504_v25 = vpack.c.bf16 %v783_v11, %v781_v12  ;;  %v543_v26 = vpop.permute.xlu0 %542  ;;  %v1506_v32 = vpack.c.bf16 %v788_v17, %v786_v16  ;;  %v801_v16 = vld [vmem:[#allocation5 + $0x320] sm:$0xff]  ;;  %v803_v17 = vld [vmem:[#allocation5 + $0x330] sm:$0xff] }
 0x252   :  { %v691_v40 = vsel %vm686_vm1, %v629_v37, %v627_v34 }
 0x253   :  { %905 = vmatprep.mubr.f32.mxu0 %v691_v40 }
 0x254   :  { %906 = vmatmul.mubr.f32.vlgmr.msra.gmra.mrb[0].mxu0 %v687_v38  ;;  %v790_v38 = vld [vmem:[#allocation5 + $0x2c8] sm:$0xff] }
 0x255   :  { %1489 = vmatpush1.bf16.msra.mxu0 %v1488_v39  ;;  %v792_v39 = vld [vmem:[#allocation5 + $0x2d8] sm:$0xff] }
 0x256   :  { %v1351_v20 = vpop.f32.mrb[4].mxu1  ;;  %1491 = vmatprep.subr.bf16.mxu0 %v1490_v45 }
 0x257   :  { %v438_v58 = vadd.f32 %v1351_v20, %v1194_v52  ;;  %v432_v44 = vpop.f32.mrb[5].mxu1  ;;  %v1510_v20 = vpack.c.bf16 %v792_v39, %v790_v38  ;;  %v805_v39 = vld [vmem:[#allocation5 + $0x340] sm:$0xff] }
 0x258   :  { %v433_v54 = vadd.f32 %v1194_v52, %v432_v44  ;;  %v678_v44 = vpop.permute.xlu0 %677 }
 0x259   :  { %v476_v27 = vadd.f32 %v1195_v36, %v438_v58  ;;  %1493 = vmatpush1.bf16.msra.mxu0 %v1492_v53  ;;  %v796_v58 = vld [vmem:[#allocation5 + $0x2f8] sm:$0xff]  ;;  %1624 = vrcp.f32 %v678_v44 }
 0x25a   :  { %v475_v62 = vadd.f32 %v1195_v36, %v433_v54  ;;  %v1354_v21 = vpop.f32.mrb[6].mxu1  ;;  %1495 = vmatprep.subr.bf16.mxu0 %v1494_v56  ;;  %v791_v56 = vld [vmem:[#allocation5 + $0x2d0] sm:$0xff]  ;;  %v820_v44 = vld [vmem:[#allocation5 + $0x3b8] sm:$0xff] }
 0x25b   :  { %v546_v2 = vmul.f32 %v523_v49, %v476_v27  ;;  %v448_v3 = vadd.f32 %v1354_v21, %v1194_v52  ;;  %v442_v42 = vpop.f32.mrb[7].mxu1  ;;  %v1508_v49 = vpack.c.bf16 %v787_v41, %v785_v33  ;;  %v793_v21 = vld [vmem:[#allocation5 + $0x2e0] sm:$0xff]  ;;  %v1524_v33 = vpack.c.bf16 %v803_v17, %v801_v16 }
 0x25c   :  { %v545_v46 = vmul.f32 %v518_v19, %v475_v62  ;;  %v443_v35 = vadd.f32 %v1194_v52, %v442_v42  ;;  %v1514_v62 = vpack.c.bf16 %v796_v58, %v794_v43  ;;  %v800_v42 = vld [vmem:[#allocation5 + $0x318] sm:$0xff]  ;;  %v815_v43 = vld [vmem:[#allocation5 + $0x390] sm:$0xff]  ;;  %v818_v58 = vld [vmem:[#allocation5 + $0x3a8] sm:$0xff] }
 0x25d   :  { %1497 = vmatpush1.bf16.msra.mxu0 %v1496_v55  ;;  %v478_v24 = vadd.f32 %v1196_v6, %v448_v3  ;;  %v798_v3 = vld [vmem:[#allocation5 + $0x308] sm:$0xff] }
 0x25e   :  { %v630_v7 = vadd.f32 %v546_v2, %v545_v46  ;;  %v477_v8 = vadd.f32 %v1195_v36, %v443_v35  ;;  %v1357_v9 = vpop.f32.mrb[8].mxu1  ;;  %1499 = vmatprep.subr.bf16.mxu0 %v1498_v63  ;;  %v789_v36 = vld [vmem:[#allocation5 + $0x2c0] sm:$0xff]  ;;  %v795_v63 = vld [vmem:[#allocation5 + $0x2f0] sm:$0xff] }
 0x25f   :  { %v458_v14 = vadd.f32 %v1357_v9, %v1194_v52  ;;  %v452_v15 = vpop.f32.mrb[9].mxu1  ;;  %v548_v34 = vmul.f32 %v533_v61, %v478_v24  ;;  %v1512_v27 = vpack.c.bf16 %v791_v56, %v789_v36  ;;  %v797_v35 = vld [vmem:[#allocation5 + $0x300] sm:$0xff]  ;;  %v802_v9 = vld [vmem:[#allocation5 + $0x328] sm:$0xff] }
 0x260   :  { %v547_v29 = vmul.f32 %v528_v13, %v477_v8  ;;  %v453_v18 = vadd.f32 %v1194_v52, %v452_v15 }
 0x261   :  { %v480_v19 = vadd.f32 %v1196_v6, %v458_v14  ;;  %1501 = vmatpush1.bf16.msra.mxu0 %v1500_v23  ;;  %v799_v23 = vld [vmem:[#allocation5 + $0x310] sm:$0xff] }
 0x262   :  { %v565_v30 = vmax.f32 %v545_v46, %v547_v29  ;;  %v631_v22 = vadd.f32 %v630_v7, %v547_v29  ;;  %v479_v31 = vadd.f32 %v1196_v6, %v453_v18  ;;  %1503 = vmatprep.subr.bf16.mxu0 %v1502_v10  ;;  %v1516_v46 = vpack.c.bf16 %v795_v63, %v793_v21  ;;  %v804_v10 = vld [vmem:[#allocation5 + $0x338] sm:$0xff]  ;;  %v821_v63 = vld [vmem:[#allocation5 + $0x3c0] sm:$0xff] }
 0x263   :  { %v550_v37 = vmul.f32 %v543_v26, %v480_v19  ;;  %v1518_v6 = vpack.c.bf16 %v800_v42, %v798_v3  ;;  %v1520_v24 = vpack.c.bf16 %v799_v23, %v797_v35  ;;  %v1522_v15 = vpack.c.bf16 %v804_v10, %v802_v9  ;;  %v1623_v19 = vpop.eup %1622  ;;  %v808_v26 = vld [vmem:[#allocation5 + $0x358] sm:$0xff]  ;;  %v829_v23 = vld [vmem:[%s2224_s7] ss:$8 sm:$0x3] }
 0x264   :  { %v566_v40 = vmax.f32 %v565_v30, %v546_v2  ;;  %v632_v45 = vrot.slane %v631_v22, 4  ;;  %v549_v47 = vmul.f32 %v538_v28, %v479_v31 }
 0x265   :  { %v573_v48 = vmax.f32 %v548_v34, %v550_v37  ;;  %1505 = vmatpush1.bf16.msra.mxu0 %v1504_v25  ;;  %v806_v25 = vld [vmem:[#allocation5 + $0x348] sm:$0xff] }
 0x266   :  { %v567_v51 = vrot.slane %v566_v40, 4  ;;  %v633_v52 = vadd.f32 %v632_v45, %v631_v22  ;;  %v638_v53 = vadd.f32 %v549_v47, %v548_v34  ;;  %1507 = vmatprep.subr.bf16.mxu0 %v1506_v32  ;;  %v1625_v32 = vpop.eup %1624  ;;  %v1526_v38 = vpack.c.bf16 %v808_v26, %v806_v25  ;;  %v810_v45 = vld [vmem:[#allocation5 + $0x368] sm:$0xff] }
 0x267   :  { %v574_v57 = vmax.f32 %v573_v48, %v549_v47  ;;  %v812_v47 = vld [vmem:[#allocation5 + $0x378] sm:$0xff]  ;;  %v1038_v26 = vld [vmem:[%s2228_s11 + $0x8] sm:$0xff] }
 0x268   :  { %v568_v59 = vmax.f32 %v566_v40, %v567_v51  ;;  %v634_v60 = vrot.slane %v633_v52, 2  ;;  %v639_v54 = vadd.f32 %v638_v53, %v550_v37  ;;  %v807_v40 = vld [vmem:[#allocation5 + $0x350] sm:$0xff]  ;;  %v1530_v50 = vpack.c.bf16 %v812_v47, %v810_v45  ;;  %v809_v51 = vld [vmem:[#allocation5 + $0x360] sm:$0xff]  ;;  %v814_v53 = vld [vmem:[#allocation5 + $0x388] sm:$0xff] }
 0x269   :  { %v575_v61 = vrot.slane %v574_v57, 4  ;;  %1509 = vmatpush1.bf16.msra.mxu0 %v1508_v49  ;;  %v1528_v49 = vpack.c.bf16 %v807_v40, %v805_v39  ;;  %v1041_v40 = vld [vmem:[%s2228_s11 + $0x20] sm:$0xff]  ;;  %v1042_v45 = vld [vmem:[%s2228_s11 + $0x28] sm:$0xff] }
 0x26a   :  { %v640_v55 = vrot.slane %v639_v54, 4  ;;  %1511 = vmatprep.subr.bf16.mxu0 %v1510_v20  ;;  %v635_v0 = vadd.f32 %v634_v60, %v633_v52  ;;  %v569_v1 = vrot.slane %v568_v59, 2  ;;  %v811_v52 = vld [vmem:[#allocation5 + $0x370] sm:$0xff]  ;;  %v816_v20 = vld [vmem:[#allocation5 + $0x398] sm:$0xff]  ;;  %v1538_v60 = vpack.c.bf16 %v820_v44, %v818_v58 }
 0x26b   :  { %v576_v2 = vmax.f32 %v574_v57, %v575_v61  ;;  %v1532_v36 = vpack.c.bf16 %v811_v52, %v809_v51  ;;  %v1534_v56 = vpack.c.bf16 %v816_v20, %v814_v53  ;;  %v813_v57 = vld [vmem:[#allocation5 + $0x380] sm:$0xff]  ;;  %v819_v61 = vld [vmem:[#allocation5 + $0x3b0] sm:$0xff]  ;;  %v1560_v47 = vpack.c.bf16 %v1042_v45, %v1041_v40 }
 0x26c   :  { %v641_v4 = vadd.f32 %v640_v55, %v639_v54  ;;  %v570_v5 = vmax.f32 %v568_v59, %v569_v1  ;;  %v636_v7 = vrot.slane %v635_v0, 1  ;;  %v1536_v59 = vpack.c.bf16 %v815_v43, %v813_v57  ;;  %v817_v54 = vld [vmem:[#allocation5 + $0x3a0] sm:$0xff]  ;;  %v824_v55 = vld [vmem:[#allocation5 + $0x3d8] sm:$0xff]  ;;  %v826_v1 = vld [vmem:[#allocation5 + $0x3e8] sm:$0xff] }
 0x26d   :  { %v577_v28 = vrot.slane %v576_v2, 2  ;;  %1513 = vmatpush1.bf16.msra.mxu0 %v1512_v27  ;;  %v822_v27 = vld [vmem:[#allocation5 + $0x3c8] sm:$0xff]  ;;  %v1059_v57 = vld [vmem:[%s2228_s11 + $0xb0] sm:$0xff]  ;;  %v1060_v43 = vld [vmem:[%s2228_s11 + $0xb8] sm:$0xff] }
 0x26e   :  { %1515 = vmatprep.subr.bf16.mxu0 %v1514_v62  ;;  %v642_v8 = vrot.slane %v641_v4, 2  ;;  %v571_v12 = vrot.slane %v570_v5, 1  ;;  %v637_v29 = vadd.f32 %v636_v7, %v635_v0  ;;  %v1540_v62 = vpack.c.bf16 %v819_v61, %v817_v54  ;;  %v823_v0 = vld [vmem:[#allocation5 + $0x3d0] sm:$0xff]  ;;  %v1061_v54 = vld [vmem:[%s2228_s11 + $0xc0] sm:$0xff]  ;;  %v1062_v61 = vld [vmem:[%s2228_s11 + $0xc8] sm:$0xff] }
 0x26f   :  { %v578_v11 = vmax.f32 %v576_v2, %v577_v28  ;;  %v1542_v21 = vpack.c.bf16 %v824_v55, %v822_v27  ;;  %v828_v2 = vld [vmem:[#allocation5 + $0x3f8] sm:$0xff]  ;;  %v1544_v3 = vpack.c.bf16 %v823_v0, %v821_v63  ;;  %v1562_v58 = vpack.c.bf16 %v1060_v43, %v1059_v57  ;;  %v1043_v44 = vld [vmem:[%s2228_s11 + $0x30] sm:$0xff]  ;;  %v1045_v55 = vld [vmem:[%s2228_s11 + $0x40] sm:$0xff] }
 0x270   :  { %v643_v13 = vadd.f32 %v642_v8, %v641_v4  ;;  %v572_v30 = vmax.f32 %v570_v5, %v571_v12  ;;  %v681_v34 = vmul.f32 %v1623_v19, %v637_v29  ;;  %v1546_v42 = vpack.c.bf16 %v828_v2, %v826_v1  ;;  %v825_v4 = vld [vmem:[#allocation5 + $0x3e0] sm:$0xff]  ;;  %v827_v5 = vld [vmem:[#allocation5 + $0x3f0] sm:$0xff]  ;;  %v1064_v0 = vld [vmem:[%s2228_s11 + $0xd8] sm:$0xff] }
 0x271   :  { %1517 = vmatpush1.bf16.msra.mxu0 %v1516_v46  ;;  %v579_v14 = vrot.slane %v578_v11, 1  ;;  %v1548_v28 = vpack.c.bf16 %v827_v5, %v825_v4  ;;  %v831_v46 = vlaneseq  ;;  %v1053_v29 = vld [vmem:[%s2228_s11 + $0x80] sm:$0xff]  ;;  %v1566_v27 = vpack.c.bf16 %v1062_v61, %v1061_v54  ;;  %v1063_v63 = vld [vmem:[%s2228_s11 + $0xd0] sm:$0xff]  ;;  %v1066_v5 = vld [vmem:[%s2228_s11 + $0xe8] sm:$0xff] }
 0x272   :  { %1519 = vmatprep.subr.bf16.mxu0 %v1518_v6  ;;  %v644_v18 = vrot.slane %v643_v13, 1  ;;  %v1037_v19 = vld [vmem:[%s2228_s11] sm:$0xff]  ;;  %v1570_v1 = vpack.c.bf16 %v1064_v0, %v1063_v63  ;;  %v1047_v2 = vld [vmem:[%s2228_s11 + $0x50] sm:$0xff] }
 0x273   :  { %v580_v22 = vmax.f32 %v578_v11, %v579_v14  ;;  %v2076_v6 = vshrl.u32 %v831_v46, 7  ;;  %v1065_v4 = vld [vmem:[%s2228_s11 + $0xe0] sm:$0xff] }
 0x274   :  { %v645_v31 = vadd.f32 %v644_v18, %v643_v13  ;;  %v1054_v18 = vld [vmem:[%s2228_s11 + $0x88] sm:$0xff]  ;;  %v1049_v46 = vld [vmem:[%s2228_s11 + $0x60] sm:$0xff] }
 0x275   :  { %1521 = vmatpush1.bf16.msra.mxu0 %v1520_v24  ;;  %v695_v41 = vsel %vm686_vm1, %v580_v22, %v572_v30  ;;  %v2079_v35 = vsub.s32 0, %v2076_v6  ;;  %v2085_v7 = vsub.s32 1, %v2076_v6  ;;  %v1550_v25 = vpack.c.bf16 %v1054_v18, %v1053_v29  ;;  %v1055_v30 = vld [vmem:[%s2228_s11 + $0x90] sm:$0xff]  ;;  %v1056_v22 = vld [vmem:[%s2228_s11 + $0x98] sm:$0xff]  ;;  %v1199_v45 = vld [vmem:[%s2223_s6 + $0x4] ss:$0 sm:$0xff] }
 0x276   :  { %1523 = vmatprep.subr.bf16.mxu0 %v1522_v15  ;;  %v683_v37 = vmul.f32 %v1625_v32, %v645_v31  ;;  %v1552_v31 = vpack.c.bf16 %v1038_v26, %v1037_v19  ;;  %v1554_v32 = vpack.c.bf16 %v1056_v22, %v1055_v30  ;;  %v1198_v29 = vld [vmem:[%s2224_s7 + $0x2] ss:$8 sm:$0x3] }
 0x277   :  { %v834_v8 = vrot.slane %v829_v23, %v2079_v35  ;;  %v838_v9 = vrot.slane %v829_v23, %v2085_v7  ;;  %1551 = vmatprep.subr.bf16.mxu1 %v1550_v25  ;;  %v1050_v23 = vld [vmem:[%s2228_s11 + $0x68] sm:$0xff]  ;;  %v1028_v22 = vrot.slane %v1198_v29, %v2079_v35 }
 0x278   :  { %v699_v48 = vsel %vm686_vm1, %v683_v37, %v681_v34  ;;  %v1057_v34 = vld [vmem:[%s2228_s11 + $0xa0] sm:$0xff]  ;;  %v1058_v37 = vld [vmem:[%s2228_s11 + $0xa8] sm:$0xff]  ;;  %1553 = vmatpush3.bf16.msra.mxu1 %v1552_v31  ;;  %v1032_v31 = vrot.slane %v1198_v29, %v2085_v7 }
 0x279   :  { %1525 = vmatpush1.bf16.msra.mxu0 %v1524_v33  ;;  %976 = vmatprep.mubr.f32.mxu0 %v699_v48  ;;  %v1039_v33 = vld [vmem:[%s2228_s11 + $0x10] sm:$0xff]  ;;  %v1558_v39 = vpack.c.bf16 %v1058_v37, %v1057_v34  ;;  %v1707_v37 = vmov 1966171168  }
 0x27a   :  { %1527 = vmatprep.subr.bf16.mxu0 %v1526_v38  ;;  %1555 = vmatprep.subr.bf16.mxu1 %v1554_v32 }
 0x27d   :  { %1529 = vmatpush1.bf16.msra.mxu0 %v1528_v49 }
 0x27e   :  { %1531 = vmatprep.subr.bf16.mxu0 %v1530_v50 }
 0x281   :  { %1533 = vmatpush1.bf16.msra.mxu0 %v1532_v36 }
 0x282   :  { %1535 = vmatprep.subr.bf16.mxu0 %v1534_v56 }
 0x285   :  { %1537 = vmatpush1.bf16.msra.mxu0 %v1536_v59  ;;  %v1044_v59 = vld [vmem:[%s2228_s11 + $0x38] sm:$0xff] }
 0x286   :  { %1539 = vmatprep.subr.bf16.mxu0 %v1538_v60  ;;  %v1564_v60 = vpack.c.bf16 %v1044_v59, %v1043_v44 }
 0x289   :  { %1541 = vmatpush1.bf16.msra.mxu0 %v1540_v62  ;;  %v1046_v62 = vld [vmem:[%s2228_s11 + $0x48] sm:$0xff] }
 0x28a   :  { %1543 = vmatprep.subr.bf16.mxu0 %v1542_v21  ;;  %v1568_v21 = vpack.c.bf16 %v1046_v62, %v1045_v55 }
 0x28d   :  { %1545 = vmatpush1.bf16.msra.mxu0 %v1544_v3  ;;  %v1048_v3 = vld [vmem:[%s2228_s11 + $0x58] sm:$0xff] }
 0x28e   :  { %1547 = vmatprep.subr.bf16.mxu0 %v1546_v42  ;;  %v1572_v42 = vpack.c.bf16 %v1048_v3, %v1047_v2 }
 0x291   :  { %1549 = vmatpush1.bf16.msra.mxu0 %v1548_v28  ;;  %v1574_v28 = vpack.c.bf16 %v1066_v5, %v1065_v4 }
 0x294   :  { %977 = vmatmul.mubr.f32.vlgmr.msra.gmra.mrb[0].mxu0 %v695_v41  ;;  %v1040_v41 = vld [vmem:[%s2228_s11 + $0x18] sm:$0xff] }
 0x295   :  { %v1556_v38 = vpack.c.bf16 %v1040_v41, %v1039_v33 }
 0x297   :  { %1557 = vmatpush3.bf16.msra.mxu1 %v1556_v38  ;;  %v1146_v38 = vunpack.c.l.s4 %v1707_v37 }
 0x298   :  { %1559 = vmatprep.subr.bf16.mxu1 %v1558_v39 }
 0x299   :  { %v1147_v39 = vunpack.c.0.s8 %v1146_v38 }
 0x29b   :  { %1561 = vmatpush3.bf16.msra.mxu1 %v1560_v47 }
 0x29c   :  { %1563 = vmatprep.subr.bf16.mxu1 %v1562_v58 }
 0x29f   :  { %1565 = vmatpush3.bf16.msra.mxu1 %v1564_v60 }
 0x2a0   :  { %1567 = vmatprep.subr.bf16.mxu1 %v1566_v27 }
 0x2a3   :  { %1569 = vmatpush3.bf16.msra.mxu1 %v1568_v21 }
 0x2a4   :  { %1571 = vmatprep.subr.bf16.mxu1 %v1570_v1 }
 0x2a7   :  { %1573 = vmatpush3.bf16.msra.mxu1 %v1572_v42 }
 0x2a8   :  { %1575 = vmatprep.subr.bf16.mxu1 %v1574_v28 }
 0x367   :  { %v978_v10 = vpop.f32.mrb[0].mxu0 }
 0x368   :  { %v1582_v12 = vadd.f32 %v978_v10, %v834_v8  ;;  %v980_v11 = vpop.f32.mrb[1].mxu0  ;;  %v1576_v8 = vpack.c.bf16 %v1050_v23, %v1049_v46  ;;  %v1068_v10 = vld [vmem:[%s2228_s11 + $0xf8] sm:$0xff] }
 0x369   :  { %v1583_v13 = vadd.f32 %v980_v11, %v838_v9  ;;  %v1067_v9 = vld [vmem:[%s2228_s11 + $0xf0] sm:$0xff] }
 0x36a   :  { %v983_v24 = vmax.f32 %v1582_v12, 0.0  ;;  %1577 = vmatpush3.bf16.msra.mxu1 %v1576_v8  ;;  %v1051_v12 = vld [vmem:[%s2228_s11 + $0x70] sm:$0xff]  ;;  %v1578_v11 = vpack.c.bf16 %v1068_v10, %v1067_v9 }
 0x36b   :  { %v984_v14 = vmax.f32 %v1583_v13, 0.0  ;;  %v1052_v13 = vld [vmem:[%s2228_s11 + $0x78] sm:$0xff] }
 0x36c   :  { %v990_v15 = vsel %vm989_vm2, %v983_v24, 0.0  ;;  %1579 = vmatprep.subr.bf16.mxu1 %v1578_v11 }
 0x36d   :  { %v991_v16 = vsel %vm989_vm2, %v984_v14, 0.0 }
 0x36e   :  { %v992_v17 = vadd.f32 %v991_v16, %v990_v15 }
 0x370   :  { %993 = vadd.xlane.f32.xlu1 %v992_v17  ;;  %v1197_v17 = vld [vmem:[%s2224_s7 + $0x1] ss:$8 sm:$0x3] }
 0x371   :  { %v1015_v18 = vrot.slane %v1197_v17, %v2079_v35  ;;  %v1019_v19 = vrot.slane %v1197_v17, %v2085_v7  ;;  %v1150_v35 = vsub.s32 %v1147_v39, %v2076_v6 }
 0x3fd   :  { %v994_v48 = vpop.xlane.xlu1 %993 }
 0x3fe   :  { %v996_v49 = vmul.f32 0.00390625, %v994_v48 }
 0x400   :  { %v997_v50 = vsub.f32 %v983_v24, %v996_v49  ;;  %v998_v51 = vsub.f32 %v984_v14, %v996_v49  ;;  %v1580_v24 = vpack.c.bf16 %v1052_v13, %v1051_v12 }
 0x402   :  { %v999_v52 = vmul.f32 %v997_v50, %v997_v50  ;;  %v1000_v53 = vmul.f32 %v998_v51, %v998_v51  ;;  %1581 = vmatpush3.bf16.msra.mxu1 %v1580_v24 }
 0x404   :  { %v1001_v20 = vsel %vm989_vm2, %v999_v52, 0.0  ;;  %v1002_v36 = vsel %vm989_vm2, %v1000_v53, 0.0 }
 0x405   :  { %v1003_v56 = vadd.f32 %v1002_v36, %v1001_v20 }
 0x407   :  { %1004 = vadd.xlane.f32.xlu0 %v1003_v56 }
 0x494   :  { %v1005_v14 = vpop.xlane.xlu0 %1004 }
 0x495   :  { %v1006_v15 = vmul.f32 0.00390625, %v1005_v14 }
 0x497   :  { %v1007_v16 = vadd.f32 1e-05, %v1006_v15 }
 0x499   :  { %1626 = vrsqrt.f32 %v1007_v16 }
 0x4a3   :  { %v1627_v25 = vpop.eup %1626 }
 0x4a4   :  { %v1009_v26 = vmul.f32 %v1627_v25, %v997_v50  ;;  %v1010_v30 = vmul.f32 %v1627_v25, %v998_v51 }
 0x4a6   :  { %v1022_v32 = vmul.f32 %v1015_v18, %v1009_v26  ;;  %v1023_v33 = vmul.f32 %v1019_v19, %v1010_v30 }
 0x4a8   :  { %v1035_v41 = vadd.f32 %v1028_v22, %v1022_v32  ;;  %v1036_v34 = vadd.f32 %v1032_v31, %v1023_v33 }
 0x4aa   :  { %1138 = vmatprep.mubr.f32.mxu1 %v1036_v34 }
 0x4ab   :  { %1139 = vmatmul.mubr.f32.vlgmr.msra.gmra.mrb[10].mxu1 %v1035_v41 }
 0x57e   :  { %v1276_v40 = vpop.f32.mrb[10].mxu1 }
 0x57f   :  { %v1277_v47 = vpop.f32.mrb[11].mxu1 }
 0x580   :  { %v1278_v48 = vadd.f32 %v1277_v47, %v1276_v40 }
 0x582   :  { %v1141_v49 = vadd.f32 %v1278_v48, %v1199_v45 }
 0x584   :  { %v1151_v7 = vrot.slane %v1141_v49, %v1150_v35 }
 0x586   :  { %v1152_v50 = vcombine.high %v1151_v7, %v1151_v7  ;;  %1200 = vst.sshfl [vmem:[#allocation7] sm:$0x1 pattern:$0x73625140] %v1151_v7 }
 0x588   :  { %1201 = vst.sshfl [vmem:[#allocation7 + $0x1] sm:$0x1 pattern:$0x73625140] %v1152_v50 }
 0x589   :  { %1683 = shalt.err (!%p1680_p6)
}
 0x58a   :  { %s1684_s30 = scalar_lea.hbm %s2229_s12, 32 }
 0x58b   :  { %p1685_p7 = scmp.ne.s32.totalorder %s2229_s12, %s1684_s30  ;;  %p1688_p8 = scmp.lt.u32.totalorder %s1684_s30, %s2229_s12 }
 0x58d   :  { %p1690_p9 = pnand %p1688_p8, %p1685_p7 }
 0x58f   :  { %1693 = shalt.err (!%p1690_p9)
}
 0x590   :  { %s1709_s14 = smov 1  }
 0x591   :  { %1182 = dma.vmem_to_hbm [thread:$0]  %s1177_s28, 32, %s2229_s12, [#allocation4], %s1705_s22, %s1705_s22, %s1709_s14  }
 0x592   :  { %1698 = dma.done.wait [#allocation4], 32  }
 0x593   :  { %1699 = vsyncadd [#allocation4], 4294967264 }
 0x594   :  { %1186 = vsyncpa [#allocation3], 1 }
 0x595   :  { %1187 = vsyncpa [#allocation6], 1 }
 0x596   :  { %1188 = vsyncpa [#allocation4], 1 }

</bundles_post_ra>
